<compile_context>
chip_gen: v6e
topology: v6e:2x2x1
jax: 0.10.0
libtpu: 0.0.40
codegen_flags: <defaults>
</compile_context>

<pallas_src>
import jax
import jax.numpy as jnp
from jax.experimental import pallas as pl
from jax.experimental.pallas import tpu as pltpu

NUM_CLASS = 10      # stands in for config.num_class
PAD_CLASS = 128     # lane-dense padded output width
FEAT_DIM = 2048
HID_DIM = 256
TB = 8              # batch tile (multiple of 8 sublanes)
TF = 512            # FEAT_DIM streaming tile (2048 / 512 = 4 grid steps)


# ---------------------------------------------------------------------------
# Fused kernel (one (batch_tile, feat_tile) grid step):
#   f == 0       : pooled = sum_{HW}(x)   (mean scale folded into wf_img)
#                  h_acc  = 0
#   every step   : feat_f = relu(pooled @ Wf_img[:, f] + meta @ Wf_meta[:, f]
#                                + bf[f])
#                  h_acc += feat_f @ W1[f, :]
#   f == last    : h   = h_acc + b1            (Linear(2048, 256))
#                  h   = Dropout(0.2)(h)       (identity, eval mode)
#                  out = h @ W2_pad + b2_pad   (Linear(256, 128-pad))
# ---------------------------------------------------------------------------
def fused_kernel(x_ref, meta_ref, wf_img_ref, wf_meta_ref, bf_ref,
                 w1_ref, b1_ref, w2_ref, b2_ref, o_ref,
                 pooled_sc, h_sc):
    f = pl.program_id(1)

    @pl.when(f == 0)
    def _():
        # Global average pool over the spatial (sublane) axis, f32 accumulation.
        pooled_sc[...] = jnp.sum(x_ref[...].astype(jnp.float32), axis=-2)
        h_sc[...] = jnp.zeros_like(h_sc)

    # Feature-projection tile (concat eliminated algebraically).
    feat = (
        jnp.dot(pooled_sc[...].astype(jnp.bfloat16), wf_img_ref[...],
                preferred_element_type=jnp.float32)
        + jnp.dot(meta_ref[...].astype(jnp.bfloat16), wf_meta_ref[...],
                  preferred_element_type=jnp.float32)
        + bf_ref[...]
    )
    feat = jnp.maximum(feat, 0.0)

    # Stream the Linear(2048, 256) contraction over feat tiles.
    h_sc[...] += jnp.dot(feat.astype(jnp.bfloat16), w1_ref[...],
                         preferred_element_type=jnp.float32)

    @pl.when(f == pl.num_programs(1) - 1)
    def _():
        h = h_sc[...] + b1_ref[...]
        # nn.Dropout(0.2): identity in inference mode (no scaling, no masking).
        out = jnp.dot(h.astype(jnp.bfloat16), w2_ref[...],
                      preferred_element_type=jnp.float32) + b2_ref[...]
        o_ref[...] = out.astype(o_ref.dtype)                 # (TB, 128)


def mymodel_forward(x, meta_data, params):
    """x: (B, C, H, W) NCHW, meta_data: (B, META) -> logits (B, NUM_CLASS).

    params = (wf_img, wf_meta, bf, w1, b1, w2_pad, b2_pad); wf_img is expected
    to be pre-scaled by 1/(H*W) (the GAP mean folded host-side).
    """
    B, C, H, W = x.shape
    HW = H * W
    META = meta_data.shape[1]
    wf_img, wf_meta, bf, w1, b1, w2p, b2p = params

    # Pad batch to a multiple of the batch tile (unmasked sublane stores).
    B_pad = pl.cdiv(B, TB) * TB
    if B_pad != B:
        x = jnp.pad(x, ((0, B_pad - B), (0, 0), (0, 0), (0, 0)))
        meta_data = jnp.pad(meta_data, ((0, B_pad - B), (0, 0)))

    # (B, HW, C): channels on lanes, spatial on sublanes.
    xr = jnp.transpose(x, (0, 2, 3, 1)).reshape(B_pad, HW, C)

    n_b = B_pad // TB
    n_f = FEAT_DIM // TF

    flops = int(2 * B_pad * (C * FEAT_DIM + META * FEAT_DIM
                             + FEAT_DIM * HID_DIM + HID_DIM * PAD_CLASS)
                + B_pad * HW * C)
    bytes_accessed = int(
        xr.size * xr.dtype.itemsize
        + meta_data.size * meta_data.dtype.itemsize
        + sum(p.size * p.dtype.itemsize for p in params)
        + B_pad * PAD_CLASS * 4)

    out_pad = pl.pallas_call(
        fused_kernel,
        out_shape=jax.ShapeDtypeStruct((B_pad, PAD_CLASS), jnp.float32),
        grid_spec=pltpu.PrefetchScalarGridSpec(
            num_scalar_prefetch=0,
            grid=(n_b, n_f),
            in_specs=[
                pl.BlockSpec((TB, HW, C), lambda b, f: (b, 0, 0)),      # x
                pl.BlockSpec((TB, META), lambda b, f: (b, 0)),          # meta
                pl.BlockSpec((C, TF), lambda b, f: (0, f)),             # wf_img
                pl.BlockSpec((META, TF), lambda b, f: (0, f)),          # wf_meta
                pl.BlockSpec((1, TF), lambda b, f: (0, f)),             # bf
                pl.BlockSpec((TF, HID_DIM), lambda b, f: (f, 0)),       # w1
                pl.BlockSpec((1, HID_DIM), lambda b, f: (0, 0)),        # b1
                pl.BlockSpec((HID_DIM, PAD_CLASS), lambda b, f: (0, 0)),  # w2
                pl.BlockSpec((1, PAD_CLASS), lambda b, f: (0, 0)),      # b2
            ],
            out_specs=pl.BlockSpec((TB, PAD_CLASS), lambda b, f: (b, 0)),
            scratch_shapes=[pltpu.VMEM((TB, C), jnp.float32),      # pooled
                            pltpu.VMEM((TB, HID_DIM), jnp.float32)],  # h acc
        ),
        compiler_params=pltpu.CompilerParams(
            dimension_semantics=("parallel", "arbitrary"),
            vmem_limit_bytes=32 * 1024 * 1024),
        cost_estimate=pl.CostEstimate(flops=flops, transcendentals=0,
                                      bytes_accessed=bytes_accessed),
    )(xr, meta_data, wf_img, wf_meta, bf, w1, b1, w2p, b2p)

    return out_pad[:B, :NUM_CLASS]


if __name__ == "__main__":
    key = jax.random.PRNGKey(0)
    kx, km, k1, k2, k3, k4, k5 = jax.random.split(key, 7)

    B, C, H, W = 2, 4, 16, 16
    META = 8

    x = jax.random.normal(kx, (B, C, H, W), jnp.float32)
    meta = jax.random.normal(km, (B, META), jnp.float32)

    # Deterministic synthetic parameters (shapes implied by the module).
    wf = jax.random.normal(k1, (C + META, FEAT_DIM), jnp.float32) * 0.05
    # Fold the GAP 1/(H*W) mean scale into the image branch (host-side, once).
    wf_img = (wf[:C] * (1.0 / (H * W))).astype(jnp.bfloat16)     # (C, 2048)
    wf_meta = wf[C:].astype(jnp.bfloat16)                         # (META, 2048)
    bf = jnp.zeros((1, FEAT_DIM), jnp.float32)

    w1 = (jax.random.normal(k2, (FEAT_DIM, HID_DIM), jnp.float32)
          * (1.0 / (FEAT_DIM ** 0.5))).astype(jnp.bfloat16)
    b1 = jax.random.normal(k3, (1, HID_DIM), jnp.float32) * 0.01

    w2 = jax.random.normal(k4, (HID_DIM, NUM_CLASS), jnp.float32) * (1.0 / (HID_DIM ** 0.5))
    b2 = jax.random.normal(k5, (1, NUM_CLASS), jnp.float32) * 0.01
    # Pad the final projection to a lane-dense 128-wide slab (host-side, once).
    w2p = jnp.zeros((HID_DIM, PAD_CLASS), jnp.float32).at[:, :NUM_CLASS].set(w2)
    w2p = w2p.astype(jnp.bfloat16)
    b2p = jnp.zeros((1, PAD_CLASS), jnp.float32).at[:, :NUM_CLASS].set(b2)

    params = (wf_img, wf_meta, bf, w1, b1, w2p, b2p)

    out = mymodel_forward(x, meta, params)
    jax.block_until_ready(out)
    assert out.shape == (B, NUM_CLASS) and out.dtype == jnp.float32
    print("KERNEL_OK")
</pallas_src>

<mosaic_0001>
module attributes {stable_mosaic.version = 11 : i64} {
  func.func @fused_kernel(%arg0: i32, %arg1: i32, %arg2: memref<8x256x4xf32, #tpu.memory_space<vmem>>, %arg3: memref<8x8xf32, #tpu.memory_space<vmem>>, %arg4: memref<4x512xbf16, #tpu.memory_space<vmem>>, %arg5: memref<8x512xbf16, #tpu.memory_space<vmem>>, %arg6: memref<1x512xf32, #tpu.memory_space<vmem>>, %arg7: memref<512x256xbf16, #tpu.memory_space<vmem>>, %arg8: memref<1x256xf32, #tpu.memory_space<vmem>>, %arg9: memref<256x128xbf16, #tpu.memory_space<vmem>>, %arg10: memref<1x128xf32, #tpu.memory_space<vmem>>, %arg11: memref<8x128xf32, #tpu.memory_space<vmem>>, %arg12: memref<8x4xf32, #tpu.memory_space<vmem>>, %arg13: memref<8x256xf32, #tpu.memory_space<vmem>>) attributes {dimension_semantics = [#tpu.dimension_semantics<parallel>, #tpu.dimension_semantics<arbitrary>], iteration_bounds = array<i64: 1, 4>, scalar_prefetch = 0 : i64, scratch_operands = 2 : i64, tpu.core_type = #tpu.core_type<tc>, window_params = [{transform_indices = @transform_0, window_bounds = array<i64: 8, 256, 4>}, {transform_indices = @transform_1, window_bounds = array<i64: 8, 8>}, {transform_indices = @transform_2, window_bounds = array<i64: 4, 512>}, {transform_indices = @transform_3, window_bounds = array<i64: 8, 512>}, {transform_indices = @transform_4, window_bounds = array<i64: 1, 512>}, {transform_indices = @transform_5, window_bounds = array<i64: 512, 256>}, {pipeline_mode = #tpu.pipeline_mode<synchronous>, transform_indices = @transform_6, window_bounds = array<i64: 1, 256>}, {pipeline_mode = #tpu.pipeline_mode<synchronous>, transform_indices = @transform_7, window_bounds = array<i64: 256, 128>}, {pipeline_mode = #tpu.pipeline_mode<synchronous>, transform_indices = @transform_8, window_bounds = array<i64: 1, 128>}, {transform_indices = @transform_9, window_bounds = array<i64: 8, 128>}]} {
    %c0_i32 = arith.constant 0 : i32
    %0 = arith.cmpi eq, %arg1, %c0_i32 : i32
    %1 = arith.extui %0 : i1 to i32
    %c0_i32_0 = arith.constant 0 : i32
    %2 = arith.cmpi ne, %1, %c0_i32_0 : i32
    scf.if %2 {
      %c0_20 = arith.constant 0 : index
      %c0_21 = arith.constant 0 : index
      %c0_22 = arith.constant 0 : index
      %26 = vector.load %arg2[%c0_20, %c0_21, %c0_22] : memref<8x256x4xf32, #tpu.memory_space<vmem>>, vector<8x256x4xf32>
      %cst_23 = arith.constant dense<0.000000e+00> : vector<8x4xf32>
      %27 = vector.multi_reduction <add>, %26, %cst_23 [1] : vector<8x256x4xf32> to vector<8x4xf32>
      %c0_24 = arith.constant 0 : index
      %c0_25 = arith.constant 0 : index
      %28 = vector.load %arg12[%c0_24, %c0_25] : memref<8x4xf32, #tpu.memory_space<vmem>>, vector<8x4xf32>
      tpu.vector_store %arg12[%c0_24, %c0_25], %27 {strides = array<i32>} : memref<8x4xf32, #tpu.memory_space<vmem>>, vector<8x4xf32>,
      %cst_26 = arith.constant 0.000000e+00 : f32
      %29 = vector.broadcast %cst_26 : f32 to vector<8x256xf32>
      %c0_27 = arith.constant 0 : index
      %c0_28 = arith.constant 0 : index
      %30 = vector.load %arg13[%c0_27, %c0_28] : memref<8x256xf32, #tpu.memory_space<vmem>>, vector<8x256xf32>
      tpu.vector_store %arg13[%c0_27, %c0_28], %29 {strides = array<i32>} : memref<8x256xf32, #tpu.memory_space<vmem>>, vector<8x256xf32>,
    } else {
    }
    %c0 = arith.constant 0 : index
    %c0_1 = arith.constant 0 : index
    %3 = vector.load %arg12[%c0, %c0_1] : memref<8x4xf32, #tpu.memory_space<vmem>>, vector<8x4xf32>
    %4 = arith.truncf %3 : vector<8x4xf32> to vector<8x4xbf16>
    %c0_2 = arith.constant 0 : index
    %c0_3 = arith.constant 0 : index
    %5 = vector.load %arg4[%c0_2, %c0_3] : memref<4x512xbf16, #tpu.memory_space<vmem>>, vector<4x512xbf16>
    %cst = arith.constant dense<0.000000e+00> : vector<8x512xf32>
    %6 = tpu.matmul %4, %5, %cst {dimension_numbers = #tpu.dot_dimension_numbers<[1], [0], [0], [1], [0, 0, 1, 1], [], []>} : vector<8x4xbf16>, vector<4x512xbf16>, vector<8x512xf32> -> vector<8x512xf32>
    %c0_4 = arith.constant 0 : index
    %c0_5 = arith.constant 0 : index
    %7 = vector.load %arg3[%c0_4, %c0_5] : memref<8x8xf32, #tpu.memory_space<vmem>>, vector<8x8xf32>
    %8 = arith.truncf %7 : vector<8x8xf32> to vector<8x8xbf16>
    %c0_6 = arith.constant 0 : index
    %c0_7 = arith.constant 0 : index
    %9 = vector.load %arg5[%c0_6, %c0_7] : memref<8x512xbf16, #tpu.memory_space<vmem>>, vector<8x512xbf16>
    %cst_8 = arith.constant dense<0.000000e+00> : vector<8x512xf32>
    %10 = tpu.matmul %8, %9, %cst_8 {dimension_numbers = #tpu.dot_dimension_numbers<[1], [0], [0], [1], [0, 0, 1, 1], [], []>} : vector<8x8xbf16>, vector<8x512xbf16>, vector<8x512xf32> -> vector<8x512xf32>
    %11 = arith.addf %6, %10 : vector<8x512xf32>
    %c0_9 = arith.constant 0 : index
    %c0_10 = arith.constant 0 : index
    %12 = vector.load %arg6[%c0_9, %c0_10] : memref<1x512xf32, #tpu.memory_space<vmem>>, vector<1x512xf32>
    %13 = vector.broadcast %12 : vector<1x512xf32> to vector<8x512xf32>
    %14 = arith.addf %11, %13 : vector<8x512xf32>
    %cst_11 = arith.constant 0.000000e+00 : f32
    %15 = vector.broadcast %cst_11 : f32 to vector<8x512xf32>
    %16 = arith.maximumf %14, %15 : vector<8x512xf32>
    %c0_12 = arith.constant 0 : index
    %c0_13 = arith.constant 0 : index
    %17 = vector.load %arg13[%c0_12, %c0_13] : memref<8x256xf32, #tpu.memory_space<vmem>>, vector<8x256xf32>
    %18 = arith.truncf %16 : vector<8x512xf32> to vector<8x512xbf16>
    %c0_14 = arith.constant 0 : index
    %c0_15 = arith.constant 0 : index
    %19 = vector.load %arg7[%c0_14, %c0_15] : memref<512x256xbf16, #tpu.memory_space<vmem>>, vector<512x256xbf16>
    %cst_16 = arith.constant dense<0.000000e+00> : vector<8x256xf32>
    %20 = tpu.matmul %18, %19, %cst_16 {dimension_numbers = #tpu.dot_dimension_numbers<[1], [0], [0], [1], [0, 0, 1, 1], [], []>} : vector<8x512xbf16>, vector<512x256xbf16>, vector<8x256xf32> -> vector<8x256xf32>
    %21 = arith.addf %17, %20 : vector<8x256xf32>
    %c0_17 = arith.constant 0 : index
    %c0_18 = arith.constant 0 : index
    %22 = vector.load %arg13[%c0_17, %c0_18] : memref<8x256xf32, #tpu.memory_space<vmem>>, vector<8x256xf32>
    tpu.vector_store %arg13[%c0_17, %c0_18], %21 {strides = array<i32>} : memref<8x256xf32, #tpu.memory_space<vmem>>, vector<8x256xf32>,
    %c3_i32 = arith.constant 3 : i32
    %23 = arith.cmpi eq, %arg1, %c3_i32 : i32
    %24 = arith.extui %23 : i1 to i32
    %c0_i32_19 = arith.constant 0 : i32
    %25 = arith.cmpi ne, %24, %c0_i32_19 : i32
    scf.if %25 {
      %c0_20 = arith.constant 0 : index
      %c0_21 = arith.constant 0 : index
      %26 = vector.load %arg13[%c0_20, %c0_21] : memref<8x256xf32, #tpu.memory_space<vmem>>, vector<8x256xf32>
      %c0_22 = arith.constant 0 : index
      %c0_23 = arith.constant 0 : index
      %27 = vector.load %arg8[%c0_22, %c0_23] : memref<1x256xf32, #tpu.memory_space<vmem>>, vector<1x256xf32>
      %28 = vector.broadcast %27 : vector<1x256xf32> to vector<8x256xf32>
      %29 = arith.addf %26, %28 : vector<8x256xf32>
      %30 = arith.truncf %29 : vector<8x256xf32> to vector<8x256xbf16>
      %c0_24 = arith.constant 0 : index
      %c0_25 = arith.constant 0 : index
      %31 = vector.load %arg9[%c0_24, %c0_25] : memref<256x128xbf16, #tpu.memory_space<vmem>>, vector<256x128xbf16>
      %cst_26 = arith.constant dense<0.000000e+00> : vector<8x128xf32>
      %32 = tpu.matmul %30, %31, %cst_26 {dimension_numbers = #tpu.dot_dimension_numbers<[1], [0], [0], [1], [0, 0, 1, 1], [], []>} : vector<8x256xbf16>, vector<256x128xbf16>, vector<8x128xf32> -> vector<8x128xf32>
      %c0_27 = arith.constant 0 : index
      %c0_28 = arith.constant 0 : index
      %33 = vector.load %arg10[%c0_27, %c0_28] : memref<1x128xf32, #tpu.memory_space<vmem>>, vector<1x128xf32>
      %34 = vector.broadcast %33 : vector<1x128xf32> to vector<8x128xf32>
      %35 = arith.addf %32, %34 : vector<8x128xf32>
      %c0_29 = arith.constant 0 : index
      %c0_30 = arith.constant 0 : index
      %36 = vector.load %arg11[%c0_29, %c0_30] : memref<8x128xf32, #tpu.memory_space<vmem>>, vector<8x128xf32>
      tpu.vector_store %arg11[%c0_29, %c0_30], %35 {strides = array<i32>} : memref<8x128xf32, #tpu.memory_space<vmem>>, vector<8x128xf32>,
    } else {
    }
    return
  }
  func.func @transform_0(%arg0: i32, %arg1: i32) -> (i32, i32, i32) {
    %c0_i32 = arith.constant 0 : i32
    %c0_i32_0 = arith.constant 0 : i32
    %c0_i32_1 = arith.constant 0 : i32
    return %arg0, %c0_i32, %c0_i32_0 : i32, i32, i32
  }
  func.func @transform_1(%arg0: i32, %arg1: i32) -> (i32, i32) {
    %c0_i32 = arith.constant 0 : i32
    %c0_i32_0 = arith.constant 0 : i32
    return %arg0, %c0_i32 : i32, i32
  }
  func.func @transform_2(%arg0: i32, %arg1: i32) -> (i32, i32) {
    %c0_i32 = arith.constant 0 : i32
    %c0_i32_0 = arith.constant 0 : i32
    return %c0_i32, %arg1 : i32, i32
  }
  func.func @transform_3(%arg0: i32, %arg1: i32) -> (i32, i32) {
    %c0_i32 = arith.constant 0 : i32
    %c0_i32_0 = arith.constant 0 : i32
    return %c0_i32, %arg1 : i32, i32
  }
  func.func @transform_4(%arg0: i32, %arg1: i32) -> (i32, i32) {
    %c0_i32 = arith.constant 0 : i32
    %c0_i32_0 = arith.constant 0 : i32
    return %c0_i32, %arg1 : i32, i32
  }
  func.func @transform_5(%arg0: i32, %arg1: i32) -> (i32, i32) {
    %c0_i32 = arith.constant 0 : i32
    %c0_i32_0 = arith.constant 0 : i32
    return %arg1, %c0_i32 : i32, i32
  }
  func.func @transform_6(%arg0: i32, %arg1: i32) -> (i32, i32) {
    %c0_i32 = arith.constant 0 : i32
    %c0_i32_0 = arith.constant 0 : i32
    %c0_i32_1 = arith.constant 0 : i32
    return %c0_i32, %c0_i32_0 : i32, i32
  }
  func.func @transform_7(%arg0: i32, %arg1: i32) -> (i32, i32) {
    %c0_i32 = arith.constant 0 : i32
    %c0_i32_0 = arith.constant 0 : i32
    %c0_i32_1 = arith.constant 0 : i32
    return %c0_i32, %c0_i32_0 : i32, i32
  }
  func.func @transform_8(%arg0: i32, %arg1: i32) -> (i32, i32) {
    %c0_i32 = arith.constant 0 : i32
    %c0_i32_0 = arith.constant 0 : i32
    %c0_i32_1 = arith.constant 0 : i32
    return %c0_i32, %c0_i32_0 : i32, i32
  }
  func.func @transform_9(%arg0: i32, %arg1: i32) -> (i32, i32) {
    %c0_i32 = arith.constant 0 : i32
    %c0_i32_0 = arith.constant 0 : i32
    return %arg0, %c0_i32 : i32, i32
  }
}

</mosaic_0001>

<bundles_post_ra>
// kernel: tpu_custom_call.1
= control target key start
LH: loop header
LB: loop body
LE: loop exit
PB: predicated region body
PF: predicated region fallthrough
CT: control target
= control target key end

     0   :  { %s4550_s0 = inlined_call_operand.vmem [shape: f32[8,256,4], index: 0, kind: input, shape index: {}]   ;;  %s4551_s1 = inlined_call_operand.vmem [shape: f32[8,8], index: 1, kind: input, shape index: {}]   ;;  %s4552_s2 = inlined_call_operand.hbm [shape: bf16[4,2048], index: 2, kind: input, shape index: {}]   ;;  %s4553_s3 = inlined_call_operand.vmem [shape: bf16[8,2048], index: 3, kind: input, shape index: {}]   ;;  %s4554_s4 = inlined_call_operand.hbm [shape: f32[1,2048], index: 4, kind: input, shape index: {}]   ;;  %s4555_s5 = inlined_call_operand.vmem [shape: bf16[2048,256], index: 5, kind: input, shape index: {}]   ;;  %s4556_s6 = inlined_call_operand.hbm [shape: f32[1,256], index: 6, kind: input, shape index: {}]   ;;  %s4557_s7 = inlined_call_operand.hbm [shape: bf16[256,128], index: 7, kind: input, shape index: {}]   ;;  %s4558_s8 = inlined_call_operand.vmem [shape: f32[1,128], index: 8, kind: input, shape index: {}]   ;;  %s4559_s9 = inlined_call_operand.hbm [shape: f32[8,128], index: 9, kind: output, shape index: {}]  }
   0x1   :  { %4565 = sst [smem:[#allocation23_spill]] %s4552_s2 }
   0x2   :  { %4566 = sst [smem:[#allocation24_spill]] %s4556_s6 }
   0x3   :  { %4567 = sst [smem:[#allocation25_spill]] %s4557_s7 }
   0x4   :  { %14 = vsyncpa [#allocation5], 0 }
   0x5   :  { %16 = vsyncpa [#allocation5 + $0x1], 0 }
   0x6   :  { %17 = vsyncpa [#allocation8], 0 }
   0x7   :  { %19 = vsyncpa [#allocation8 + $0x1], 0 }
   0x8   :  { %20 = vsyncpa [#allocation11], 0 }
   0x9   :  { %21 = vsyncpa [#allocation6], 0  ;;  %s3070_s30 = smov 0   ;;  %s3072_s10 = smov 0  }
   0xa   :  { %s3074_s11 = smov 0   ;;  %s3076_s12 = smov 0  }
   0xb   :  { %s3078_s13 = smov 0   ;;  %s3080_s14 = smov 0  }
   0xc LB: > { %4568 = sst [smem:[#allocation18_spill]] %s2996_s11  ;;  %s3099_s15 = sadd.s32 4294967295, %s3008_s14   ;;  %s3008_s14 = sphi %s3080_s14, %s27_s14   ;;  %s3004_s13 = sphi %s3078_s13, %s4594_s13   ;;  %s3000_s12 = sphi %s3076_s12, %s4593_s12   ;;  %s2996_s11 = sphi %s3074_s11, %s4589_s11   ;;  %s2992_s10 = sphi %s3072_s10, %s4592_s10   ;;  %s2988_s30 = sphi %s3070_s30, %s4591_s30  }
   0xd   : > { %p111_p0 = scmp.ne.s32.totalorder %s2992_s10, %s2988_s30  ;;  %p4560_p1 = scmp.eq.s32.totalorder %s3099_s15, 0 }
   0xe   : > { %p2454_p2 = scmp.ge.s32.totalorder %s3008_s14, 1  ;;  %p289_p3 = scmp.lt.s32.totalorder %s3008_s14, 5 }
   0xf   : > { %p3107_p4 = por %p4560_p1, %p111_p0  ;;  %s3010_s18 = smov [#allocation9]  }
  0x10   : > { %p3111_p5 = pnand %p2454_p2, %p289_p3  ;;  %s319_s19 = sshll.u32 %s3010_s18, 4  ;;  %s320_s19 = int_to_ptr.vmem [resolvable:$true] %s319_s19 }
  0x11   : > { %s4569_s16 = scalar_select %p3107_p4, 1, 0 }
  0x12   : > { %s4570_s17 = scalar_select %p3111_p5, 1, 0 }
  0x13   : > { %p2616_p6 = pneg %p3111_p5  ;;  %s3011_s20 = smov [#allocation10]  }
  0x14   : > { %s329_s21 = sshll.u32 %s3011_s20, 4  ;;  %s2821_s23 = scalar_lea.vmem %s320_s19, 32  ;;  %s330_s21 = int_to_ptr.vmem [resolvable:$true] %s329_s21 }
  0x15   : > { %p3119_p7 = pnand %p2616_p6, %p4560_p1  ;;  %p2822_p9 = scmp.ne.s32.totalorder %s320_s19, %s2821_s23 }
  0x16   : > { %p2829_p12 = scmp.lt.s32.totalorder %s320_s19, %s320_s19  ;;  %p2830_p13 = scmp.lt.s32.totalorder %s2821_s23, %s2821_s23 }
  0x17   : > { %p2812_p8 = pneg %p3119_p7 }
  0x18   : > { %p2831_p0 = por %p2830_p13, %p2829_p12 }
  0x19   : > { %p2824_p10 = pnand %p2822_p9, %p2812_p8 }
  0x1b   : > { %p2825_p11 = pneg %p2824_p10 }
  0x1d   : > { %p2832_p2 = pnand %p2831_p0, %p2825_p11 }
  0x1f   : > { %2835 = shalt.err (!%p2832_p2)
}
  0x20   : > { %s4572_s6 = sld [smem:[#allocation24_spill]]  ;;  %s2847_s26 = scalar_lea.vmem %s330_s21, 2048 }
  0x21   : > { %p2848_p3 = scmp.ne.s32.totalorder %s330_s21, %s2847_s26  ;;  %p2855_p9 = scmp.lt.s32.totalorder %s330_s21, %s330_s21 }
  0x22   : > { %p2856_p10 = scmp.lt.s32.totalorder %s2847_s26, %s2847_s26 }
  0x23   : > { %p2850_p6 = pnand %p2848_p3, %p2812_p8 }
  0x24   : > { %p2857_p4 = por %p2856_p10, %p2855_p9 }
  0x25   : > { %p2851_p1 = pneg %p2850_p6 }
  0x26   : > { %2619 = dma.hbm_to_vmem [thread:$0]  (!%p3119_p7), %s4572_s6, 32, %s320_s19, [#allocation8]  }
  0x27   : > { %p2858_p5 = pnand %p2857_p4, %p2851_p1 }
  0x29   : > { %2861 = shalt.err (!%p2858_p5)
}
  0x2a   : > { %s3012_s27 = smov 64   ;;  %s3013_s28 = smov 4  }
  0x2b   : > { %s4573_s7 = sld [smem:[#allocation25_spill]]  ;;  %s36_s18 = sadd.s32 1, %s3004_s13 }
  0x2c   : > { %s98_s19 = sadd.s32 1, %s2996_s11  ;;  %p37_p1 = scmp.ge.s32.totalorder %s36_s18, 4 }
  0x2d   : > { %p105_p4 = scmp.ne.s32.totalorder %s2996_s11, %s2992_s10  ;;  %p106_p5 = scmp.eq.s32.totalorder %s3008_s14, 0 }
  0x2e   : > { %p2632_p8 = scmp.lt.s32.totalorder %s3008_s14, 4  ;;  %s4596_s18 = smov (%p37_p1, %s36_s18), 0 }
  0x2f   : > { %4574 = sst [smem:[#allocation19_spill]] %s4596_s18  ;;  %p107_p11 = por %p106_p5, %p105_p4 }
  0x30   : > { %s3150_s20 = sand.u32 1, %s2996_s11   ;;  %s95_s22 = ssub.s32 %s3004_s13, %s4596_s18 }
  0x31   : > { %2622 = dma.hbm_to_vmem [thread:$0]  (!%p3119_p7), %s4573_s7, 2048, %s330_s21, [#allocation11], %s3012_s27, %s3012_s27, %s3013_s28  }
  0x32   : > { %p96_p12 = scmp.eq.s32.totalorder %s95_s22, 0  ;;  %s2460_s21 = sshll.u32 %s3150_s20, 3 }
  0x33   : > { %s2575_s23 = sshll.u32 %s3004_s13, 7  ;;  %s4576_s2 = sld [smem:[#allocation23_spill]] }
  0x34   : > { %s3157_s24 = scalar_select %p96_p12, %s2996_s11, %s98_s19  }
  0x35   : > { %s350_s28 = scalar_lea.vmem [#allocation4], %s2460_s21  ;;  %p3164_p7 = pnand %p2632_p8, %p107_p11 }
  0x36   : > { %4575 = sst [smem:[#allocation20_spill]] %s3157_s24  ;;  %s358_s29 = sshll.u32 %s350_s28, 4  ;;  %s359_s29 = int_to_ptr.vmem [resolvable:$true] %s358_s29 }
  0x37   : > { %s374_s6 = sand.u32 1, %s3008_s14   ;;  %s2463_s22 = sshll.u32 %s3150_s20, 2 }
  0x38   : > { %s347_s7 = scalar_lea.sflag [#allocation5], %s3150_s20  ;;  %p2864_p13 = pneg %p3164_p7 }
  0x39   : > { %s356_s27 = scalar_lea.hbm %s4576_s2, %s2575_s23  ;;  %s2875_s19 = scalar_lea.vmem %s359_s29, 128 }
  0x3a   : > { %p2876_p0 = scmp.ne.s32.totalorder %s359_s29, %s2875_s19  ;;  %s3014_s21 = smov [#allocation4]  }
  0x3b   : > { %s2880_s23 = sshll.u32 %s3014_s21, 4  ;;  %s2881_s23 = int_to_ptr.vmem [resolvable:$false] %s2880_s23 }
  0x3c   : > { %p2878_p2 = pnand %p2876_p0, %p2864_p13  ;;  %s2882_s25 = scalar_lea.vmem %s2881_s23, 256 }
  0x3d   : > { %p2883_p6 = scmp.lt.s32.totalorder %s359_s29, %s2881_s23  ;;  %p2884_p9 = scmp.lt.s32.totalorder %s2882_s25, %s2875_s19 }
  0x3e   : > { %p2879_p3 = pneg %p2878_p2 }
  0x3f   : > { %p2885_p10 = por %p2884_p9, %p2883_p6 }
  0x41   : > { %p2886_p1 = pnand %p2885_p10, %p2879_p3 }
  0x43   : > { %2889 = shalt.err (!%p2886_p1)
}
  0x44   : > { %2626 = dma.hbm_to_vmem [thread:$0]  (!%p3164_p7), %s356_s27, 128, %s359_s29, %s347_s7  }
  0x45   : > { %s2576_s20 = sshll.u32 %s3004_s13, 6  ;;  %s378_s18 = scalar_lea.vmem [#allocation7], %s2463_s22 }
  0x46   : > { %s384_s2 = scalar_lea.hbm %s4554_s4, %s2576_s20  ;;  %s386_s24 = sshll.u32 %s378_s18, 4  ;;  %s387_s24 = int_to_ptr.vmem [resolvable:$true] %s386_s24 }
  0x47   : > { %s375_s21 = scalar_lea.sflag [#allocation8], %s374_s6  ;;  %s2903_s11 = scalar_lea.vmem %s387_s24, 64 }
  0x48   : > { %p2904_p4 = scmp.ne.s32.totalorder %s387_s24, %s2903_s11  ;;  %s3015_s19 = smov [#allocation7]  }
  0x49   : > { %s2908_s23 = sshll.u32 %s3015_s19, 4  ;;  %s2909_s23 = int_to_ptr.vmem [resolvable:$false] %s2908_s23 }
  0x4a   : > { %p2906_p5 = pnand %p2904_p4, %p2864_p13  ;;  %s2910_s25 = scalar_lea.vmem %s2909_s23, 128 }
  0x4b   : > { %p2911_p11 = scmp.lt.s32.totalorder %s387_s24, %s2909_s23  ;;  %p2912_p12 = scmp.lt.s32.totalorder %s2910_s25, %s2903_s11 }
  0x4c   : > { %p2907_p8 = pneg %p2906_p5 }
  0x4d   : > { %p2913_p0 = por %p2912_p12, %p2911_p11 }
  0x4f   : > { %p2914_p2 = pnand %p2913_p0, %p2907_p8 }
  0x51   : > { %2917 = shalt.err (!%p2914_p2)
}
  0x52   : > { %2629 = dma.hbm_to_vmem [thread:$0]  (!%p3164_p7), %s384_s2, 64, %s387_s24, %s375_s21  }
  0x53   : > { %p4578_p3 = scmp.ne.s32.totalorder %s4570_s17, 0 }
  0x54   : > { %s407_s6 = sand.u32 (!%p4578_p3), 1, %s2992_s10   ;;  %p4579_p13 = scmp.ne.s32.totalorder (!%p4578_p3), %s4569_s16, 0 }
  0x55   : > { %405 = sbr.rel (%p4578_p3) target bundleno = 940 (0x3ac), region = 56  ;;  %s2467_s7 = sshll.u32 (!%p4578_p3), %s407_s6, 3 }
  0x56   : > { %s408_s18 = scalar_lea.sflag (!%p4578_p3), [#allocation5], %s407_s6  ;;  %s3190_s27 = scalar_lea.vmem (!%p4578_p3), [#allocation4], %s2467_s7 }
  0x5a   : > { %2967 = dma.done.wait (%p4579_p13), %s408_s18, 128  }
  0x5b   : > { %2969 = vsyncadd (%p4579_p13), %s408_s18, 4294967168  ;;  %s416_s11 = sand.u32 1, %s3099_s15   ;;  %s2468_s29 = sshll.u32 %s407_s6, 2 }
  0x5c   : > { %s417_s2 = scalar_lea.sflag [#allocation8], %s416_s11  ;;  %s3197_s24 = scalar_lea.vmem [#allocation7], %s2468_s29 }
  0x5d   : > { %2971 = dma.done.wait (%p4579_p13), %s417_s2, 64  }
  0x5e   : > { %2973 = vsyncadd (%p4579_p13), %s417_s2, 4294967232  ;;  %p4580_p7 = scmp.eq.s32.totalorder %s3099_s15, 0 }
  0x60   : > { %2975 = dma.done.wait (%p4580_p7), [#allocation8], 32   ;;  %p4581_p6 = pmov %p4580_p7 }
  0x62   : > { %2977 = vsyncadd (%p4581_p6), [#allocation8], 4294967264  ;;  %p4582_p9 = pmov %p4581_p6 }
  0x63   : > { %p4583_p10 = pmov %p4581_p6 }
  0x64   : > { %2979 = dma.done.wait (%p4582_p9), [#allocation11], 2048  }
  0x65   : > { %2981 = vsyncadd (%p4583_p10), [#allocation11], 4294965248  ;;  %s2471_s17 = sshll.u32 %s3000_s12, 2  ;;  %s2473_s30 = sshll.u32 %s3000_s12, 6 }
  0x66   : > { %p497_p1 = scmp.lt.s32.totalorder %s2471_s17, 15  ;;  %p504_p4 = scmp.lt.s32.totalorder %s2473_s30, 255 }
  0x67   : > { %p2476_p5 = scmp.ne.s32.totalorder %s3000_s12, 0 }
  0x68   : > { %s4598_s17 = smov (!%p497_p1, %s2471_s17), 15  ;;  %s4600_s30 = smov (!%p504_p4, %s2473_s30), 255 }
  0x69   : > { %s2472_s16 = sshll.u32 %s4598_s17, 2  ;;  %s2577_s28 = sshll.u32 %s4600_s30, 3 }
  0x6a   : > { %s3216_s26 = scalar_lea.vmem %s4553_s3, %s2472_s16  ;;  %s3221_s23 = scalar_lea.vmem %s4555_s5, %s2577_s28 }
  0x6b   : > { %514 = sbr.rel (%p2476_p5) target bundleno = 272 (0x110), region = 76 }
  0x70   : > { %v515_v0 = vld [vmem:[%s4550_s0] sm:$0xff]  ;;  %v516_v1 = vld [vmem:[%s4550_s0 + $0x8] sm:$0xff]  ;;  %v517_v2 = vld [vmem:[%s4550_s0 + $0x10] sm:$0xff]  ;;  %vm771_vm0 = vcmask 31744   ;;  %vm1332_vm1 = vcmask 1041409   ;;  %vm1334_vm2 = vcmask 1042434  }
  0x71   : > { %v772_v3 = vsel %vm771_vm0, %v515_v0, 0.0  ;;  %v773_v4 = vsel %vm771_vm0, %v516_v1, 0.0  ;;  %v775_v5 = vsel %vm771_vm0, %v517_v2, 0.0  ;;  %v518_v6 = vld [vmem:[%s4550_s0 + $0x18] sm:$0xff]  ;;  %v519_v10 = vld [vmem:[%s4550_s0 + $0x20] sm:$0xff]  ;;  %v520_v13 = vld [vmem:[%s4550_s0 + $0x28] sm:$0xff] }
  0x72   : > { %v774_v7 = vadd.f32 %v773_v4, %v772_v3  ;;  %v777_v9 = vsel %vm771_vm0, %v518_v6, 0.0  ;;  %v779_v12 = vsel %vm771_vm0, %v519_v10, 0.0  ;;  %v547_v14 = vld [vmem:[%s4550_s0 + $0x100] sm:$0xff]  ;;  %v548_v15 = vld [vmem:[%s4550_s0 + $0x108] sm:$0xff]  ;;  %v549_v16 = vld [vmem:[%s4550_s0 + $0x110] sm:$0xff]  ;;  %v781_v22 = vsel %vm771_vm0, %v520_v13, 0.0 }
  0x73   : > { %v841_v17 = vsel %vm771_vm0, %v547_v14, 0.0  ;;  %v550_v18 = vld [vmem:[%s4550_s0 + $0x118] sm:$0xff]  ;;  %v842_v20 = vsel %vm771_vm0, %v548_v15, 0.0  ;;  %v844_v21 = vsel %vm771_vm0, %v549_v16, 0.0  ;;  %v521_v24 = vld [vmem:[%s4550_s0 + $0x30] sm:$0xff]  ;;  %v551_v27 = vld [vmem:[%s4550_s0 + $0x120] sm:$0xff] }
  0x74   : > { %v776_v8 = vadd.f32 %v775_v5, %v774_v7  ;;  %v843_v23 = vadd.f32 %v842_v20, %v841_v17  ;;  %v846_v26 = vsel %vm771_vm0, %v550_v18, 0.0  ;;  %v783_v29 = vsel %vm771_vm0, %v521_v24, 0.0  ;;  %v522_v30 = vld [vmem:[%s4550_s0 + $0x38] sm:$0xff]  ;;  %v552_v33 = vld [vmem:[%s4550_s0 + $0x128] sm:$0xff]  ;;  %v579_v35 = vld [vmem:[%s4550_s0 + $0x200] sm:$0xff] }
  0x75   : > { %v848_v32 = vsel %vm771_vm0, %v551_v27, 0.0  ;;  %v580_v36 = vld [vmem:[%s4550_s0 + $0x208] sm:$0xff]  ;;  %v785_v37 = vsel %vm771_vm0, %v522_v30, 0.0  ;;  %v523_v38 = vld [vmem:[%s4550_s0 + $0x40] sm:$0xff]  ;;  %v581_v39 = vld [vmem:[%s4550_s0 + $0x210] sm:$0xff]  ;;  %v910_v42 = vsel %vm771_vm0, %v579_v35, 0.0 }
  0x76   : > { %v778_v11 = vadd.f32 %v777_v9, %v776_v8  ;;  %v845_v25 = vadd.f32 %v844_v21, %v843_v23  ;;  %v582_v40 = vld [vmem:[%s4550_s0 + $0x218] sm:$0xff]  ;;  %v911_v43 = vsel %vm771_vm0, %v580_v36, 0.0  ;;  %v850_v44 = vsel %vm771_vm0, %v552_v33, 0.0  ;;  %v553_v47 = vld [vmem:[%s4550_s0 + $0x130] sm:$0xff]  ;;  %v583_v50 = vld [vmem:[%s4550_s0 + $0x220] sm:$0xff] }
  0x77   : > { %v912_v45 = vadd.f32 %v911_v43, %v910_v42  ;;  %v913_v46 = vsel %vm771_vm0, %v581_v39, 0.0  ;;  %v915_v49 = vsel %vm771_vm0, %v582_v40, 0.0  ;;  %v787_v51 = vsel %vm771_vm0, %v523_v38, 0.0  ;;  %v524_v53 = vld [vmem:[%s4550_s0 + $0x48] sm:$0xff]  ;;  %v554_v57 = vld [vmem:[%s4550_s0 + $0x138] sm:$0xff]  ;;  %v525_v62 = vld [vmem:[%s4550_s0 + $0x50] sm:$0xff] }
  0x78   : > { %v780_v19 = vadd.f32 %v779_v12, %v778_v11  ;;  %v847_v31 = vadd.f32 %v846_v26, %v845_v25  ;;  %v852_v55 = vsel %vm771_vm0, %v553_v47, 0.0  ;;  %v917_v59 = vsel %vm771_vm0, %v583_v50, 0.0  ;;  %v584_v60 = vld [vmem:[%s4550_s0 + $0x228] sm:$0xff]  ;;  %v555_v2 = vld [vmem:[%s4550_s0 + $0x140] sm:$0xff]  ;;  %v585_v7 = vld [vmem:[%s4550_s0 + $0x230] sm:$0xff] }
  0x79   : > { %v914_v52 = vadd.f32 %v913_v46, %v912_v45  ;;  %v789_v61 = vsel %vm771_vm0, %v524_v53, 0.0  ;;  %v854_v0 = vsel %vm771_vm0, %v554_v57, 0.0  ;;  %v611_v3 = vld [vmem:[%s4550_s0 + $0x300] sm:$0xff]  ;;  %v612_v4 = vld [vmem:[%s4550_s0 + $0x308] sm:$0xff]  ;;  %v919_v6 = vsel %vm771_vm0, %v584_v60, 0.0  ;;  %v613_v8 = vld [vmem:[%s4550_s0 + $0x310] sm:$0xff] }
  0x7a   : > { %v782_v28 = vadd.f32 %v781_v22, %v780_v19  ;;  %v849_v41 = vadd.f32 %v848_v32, %v847_v31  ;;  %v791_v9 = vsel %vm771_vm0, %v525_v62, 0.0  ;;  %v526_v10 = vld [vmem:[%s4550_s0 + $0x58] sm:$0xff]  ;;  %v856_v13 = vsel %vm771_vm0, %v555_v2, 0.0  ;;  %v556_v17 = vld [vmem:[%s4550_s0 + $0x148] sm:$0xff]  ;;  %v615_v18 = vld [vmem:[%s4550_s0 + $0x320] sm:$0xff] }
  0x7b   : > { %v916_v56 = vadd.f32 %v915_v49, %v914_v52  ;;  %v614_v11 = vld [vmem:[%s4550_s0 + $0x318] sm:$0xff]  ;;  %v979_v15 = vsel %vm771_vm0, %v611_v3, 0.0  ;;  %v980_v16 = vsel %vm771_vm0, %v612_v4, 0.0  ;;  %v921_v20 = vsel %vm771_vm0, %v585_v7, 0.0  ;;  %v527_v26 = vld [vmem:[%s4550_s0 + $0x60] sm:$0xff]  ;;  %v616_v27 = vld [vmem:[%s4550_s0 + $0x328] sm:$0xff] }
  0x7c   : > { %v784_v34 = vadd.f32 %v783_v29, %v782_v28  ;;  %v851_v54 = vadd.f32 %v850_v44, %v849_v41  ;;  %v981_v21 = vadd.f32 %v980_v16, %v979_v15  ;;  %v982_v22 = vsel %vm771_vm0, %v613_v8, 0.0  ;;  %v586_v23 = vld [vmem:[%s4550_s0 + $0x238] sm:$0xff]  ;;  %v557_v33 = vld [vmem:[%s4550_s0 + $0x150] sm:$0xff]  ;;  %v587_v38 = vld [vmem:[%s4550_s0 + $0x240] sm:$0xff] }
  0x7d   : > { %v918_v1 = vadd.f32 %v917_v59, %v916_v56  ;;  %v793_v24 = vsel %vm771_vm0, %v526_v10, 0.0  ;;  %v984_v25 = vsel %vm771_vm0, %v614_v11, 0.0  ;;  %v858_v30 = vsel %vm771_vm0, %v556_v17, 0.0  ;;  %v528_v41 = vld [vmem:[%s4550_s0 + $0x68] sm:$0xff]  ;;  %v618_v42 = vld [vmem:[%s4550_s0 + $0x338] sm:$0xff]  ;;  %v533_v59 = vld [vmem:[%s4550_s0 + $0x90] sm:$0xff] }
  0x7e   : > { %v786_v48 = vadd.f32 %v785_v37, %v784_v34  ;;  %v853_v63 = vadd.f32 %v852_v55, %v851_v54  ;;  %v983_v29 = vadd.f32 %v982_v22, %v981_v21  ;;  %v986_v32 = vsel %vm771_vm0, %v615_v18, 0.0  ;;  %v617_v34 = vld [vmem:[%s4550_s0 + $0x330] sm:$0xff]  ;;  %v530_v49 = vld [vmem:[%s4550_s0 + $0x78] sm:$0xff]  ;;  %v531_v54 = vld [vmem:[%s4550_s0 + $0x80] sm:$0xff] }
  0x7f   : > { %v920_v14 = vadd.f32 %v919_v6, %v918_v1  ;;  %v923_v36 = vsel %vm771_vm0, %v586_v23, 0.0  ;;  %v795_v39 = vsel %vm771_vm0, %v527_v26, 0.0  ;;  %v988_v40 = vsel %vm771_vm0, %v616_v27, 0.0  ;;  %v558_v50 = vld [vmem:[%s4550_s0 + $0x158] sm:$0xff]  ;;  %v532_v55 = vld [vmem:[%s4550_s0 + $0x88] sm:$0xff]  ;;  %v559_v2 = vld [vmem:[%s4550_s0 + $0x160] sm:$0xff] }
  0x80   : > { %v788_v58 = vadd.f32 %v787_v51, %v786_v48  ;;  %v855_v12 = vadd.f32 %v854_v0, %v853_v63  ;;  %v985_v37 = vadd.f32 %v984_v25, %v983_v29  ;;  %v860_v45 = vsel %vm771_vm0, %v557_v33, 0.0  ;;  %v529_v48 = vld [vmem:[%s4550_s0 + $0x70] sm:$0xff]  ;;  %v588_v56 = vld [vmem:[%s4550_s0 + $0x248] sm:$0xff]  ;;  %v534_v60 = vld [vmem:[%s4550_s0 + $0x98] sm:$0xff] }
  0x81   : > { %v922_v31 = vadd.f32 %v921_v20, %v920_v14  ;;  %v990_v47 = vsel %vm771_vm0, %v617_v34, 0.0  ;;  %v925_v52 = vsel %vm771_vm0, %v587_v38, 0.0  ;;  %v797_v57 = vsel %vm771_vm0, %v528_v41, 0.0  ;;  %v535_v0 = vld [vmem:[%s4550_s0 + $0xa0] sm:$0xff]  ;;  %v536_v1 = vld [vmem:[%s4550_s0 + $0xa8] sm:$0xff]  ;;  %v589_v7 = vld [vmem:[%s4550_s0 + $0x250] sm:$0xff] }
  0x82   : > { %v790_v5 = vadd.f32 %v789_v61, %v788_v58  ;;  %v857_v28 = vadd.f32 %v856_v13, %v855_v12  ;;  %v987_v44 = vadd.f32 %v986_v32, %v985_v37  ;;  %v992_v58 = vsel %vm771_vm0, %v618_v42, 0.0  ;;  %v619_v61 = vld [vmem:[%s4550_s0 + $0x340] sm:$0xff]  ;;  %v537_v14 = vld [vmem:[%s4550_s0 + $0xb0] sm:$0xff]  ;;  %v538_v20 = vld [vmem:[%s4550_s0 + $0xb8] sm:$0xff] }
  0x83   : > { %v924_v46 = vadd.f32 %v923_v36, %v922_v31  ;;  %v799_v3 = vsel %vm771_vm0, %v529_v48, 0.0  ;;  %v801_v4 = vsel %vm771_vm0, %v530_v49, 0.0  ;;  %v643_v8 = vld [vmem:[%s4550_s0 + $0x400] sm:$0xff]  ;;  %v3441_v11 = vsel %vm771_vm0, %v531_v54, 0.0  ;;  %v645_v15 = vld [vmem:[%s4550_s0 + $0x410] sm:$0xff]  ;;  %v620_v21 = vld [vmem:[%s4550_s0 + $0x348] sm:$0xff] }
  0x84   : > { %v792_v19 = vadd.f32 %v791_v9, %v790_v5  ;;  %v859_v43 = vadd.f32 %v858_v30, %v857_v28  ;;  %v989_v53 = vadd.f32 %v988_v40, %v987_v44  ;;  %v862_v5 = vsel %vm771_vm0, %v558_v50, 0.0  ;;  %v644_v9 = vld [vmem:[%s4550_s0 + $0x408] sm:$0xff]  ;;  %v646_v22 = vld [vmem:[%s4550_s0 + $0x418] sm:$0xff]  ;;  %v539_v27 = vld [vmem:[%s4550_s0 + $0xc0] sm:$0xff] }
  0x85   : > { %v926_v6 = vadd.f32 %v925_v52, %v924_v46  ;;  %v927_v12 = vsel %vm771_vm0, %v588_v56, 0.0  ;;  %v3451_v16 = vsel %vm771_vm0, %v532_v55, 0.0  ;;  %v3454_v17 = vsel %vm771_vm0, %v533_v59, 0.0  ;;  %v540_v28 = vld [vmem:[%s4550_s0 + $0xc8] sm:$0xff]  ;;  %v541_v33 = vld [vmem:[%s4550_s0 + $0xd0] sm:$0xff]  ;;  %v542_v40 = vld [vmem:[%s4550_s0 + $0xd8] sm:$0xff] }
  0x86   : > { %v794_v35 = vadd.f32 %v793_v24, %v792_v19  ;;  %v861_v62 = vadd.f32 %v860_v45, %v859_v43  ;;  %v991_v63 = vadd.f32 %v990_v47, %v989_v53  ;;  %v3457_v18 = vsel %vm771_vm0, %v534_v60, 0.0  ;;  %v560_v34 = vld [vmem:[%s4550_s0 + $0x168] sm:$0xff]  ;;  %v590_v41 = vld [vmem:[%s4550_s0 + $0x258] sm:$0xff]  ;;  %v543_v46 = vld [vmem:[%s4550_s0 + $0xe0] sm:$0xff] }
  0x87   : > { %v994_v19 = vsel %vm771_vm0, %v619_v61, 0.0  ;;  %v3470_v23 = vsel %vm771_vm0, %v535_v0, 0.0  ;;  %v3473_v24 = vsel %vm771_vm0, %v536_v1, 0.0  ;;  %v864_v26 = vsel %vm771_vm0, %v559_v2, 0.0  ;;  %v621_v47 = vld [vmem:[%s4550_s0 + $0x350] sm:$0xff]  ;;  %v648_v48 = vld [vmem:[%s4550_s0 + $0x428] sm:$0xff] }
  0x88   : > { %v796_v51 = vadd.f32 %v795_v39, %v794_v35  ;;  %v993_v13 = vadd.f32 %v992_v58, %v991_v63  ;;  %v863_v25 = vadd.f32 %v862_v5, %v861_v62  ;;  %v928_v29 = vadd.f32 %v927_v12, %v926_v6  ;;  %v647_v35 = vld [vmem:[%s4550_s0 + $0x420] sm:$0xff]  ;;  %v544_v53 = vld [vmem:[%s4550_s0 + $0xe8] sm:$0xff]  ;;  %v545_v54 = vld [vmem:[%s4550_s0 + $0xf0] sm:$0xff] }
  0x89   : > { %v929_v30 = vsel %vm771_vm0, %v589_v7, 0.0  ;;  %v1048_v31 = vsel %vm771_vm0, %v643_v8, 0.0  ;;  %v1049_v32 = vsel %vm771_vm0, %v644_v9, 0.0  ;;  %v1051_v39 = vsel %vm771_vm0, %v645_v15, 0.0  ;;  %v546_v59 = vld [vmem:[%s4550_s0 + $0xf8] sm:$0xff]  ;;  %v561_v60 = vld [vmem:[%s4550_s0 + $0x170] sm:$0xff] }
  0x8a   : > { %v798_v10 = vadd.f32 %v797_v57, %v796_v51  ;;  %v995_v37 = vadd.f32 %v994_v19, %v993_v13  ;;  %v1050_v38 = vadd.f32 %v1049_v32, %v1048_v31  ;;  %v3502_v42 = vsel %vm771_vm0, %v537_v14, 0.0  ;;  %v649_v61 = vld [vmem:[%s4550_s0 + $0x430] sm:$0xff]  ;;  %v562_v2 = vld [vmem:[%s4550_s0 + $0x178] sm:$0xff]  ;;  %v563_v8 = vld [vmem:[%s4550_s0 + $0x180] sm:$0xff] }
  0x8b   : > { %v3505_v43 = vsel %vm771_vm0, %v538_v20, 0.0  ;;  %v996_v44 = vsel %vm771_vm0, %v620_v21, 0.0  ;;  %v1053_v45 = vsel %vm771_vm0, %v646_v22, 0.0  ;;  %v3519_v49 = vsel %vm771_vm0, %v539_v27, 0.0  ;;  %v622_v9 = vld [vmem:[%s4550_s0 + $0x358] sm:$0xff]  ;;  %v564_v19 = vld [vmem:[%s4550_s0 + $0x188] sm:$0xff] }
  0x8c   : > { %v800_v36 = vadd.f32 %v799_v3, %v798_v10  ;;  %v3522_v50 = vsel %vm771_vm0, %v540_v28, 0.0  ;;  %v865_v51 = vadd.f32 %v864_v26, %v863_v25  ;;  %v1052_v52 = vadd.f32 %v1051_v39, %v1050_v38  ;;  %v591_v3 = vld [vmem:[%s4550_s0 + $0x260] sm:$0xff]  ;;  %v650_v10 = vld [vmem:[%s4550_s0 + $0x438] sm:$0xff]  ;;  %v565_v20 = vld [vmem:[%s4550_s0 + $0x190] sm:$0xff] }
  0x8d   : > { %v3531_v55 = vsel %vm771_vm0, %v541_v33, 0.0  ;;  %v866_v56 = vsel %vm771_vm0, %v560_v34, 0.0  ;;  %v930_v57 = vadd.f32 %v929_v30, %v928_v29  ;;  %v1055_v58 = vsel %vm771_vm0, %v647_v35, 0.0  ;;  %v566_v27 = vld [vmem:[%s4550_s0 + $0x198] sm:$0xff]  ;;  %v567_v28 = vld [vmem:[%s4550_s0 + $0x1a0] sm:$0xff]  ;;  %v568_v34 = vld [vmem:[%s4550_s0 + $0x1a8] sm:$0xff] }
  0x8e   : > { %v802_v62 = vadd.f32 %v801_v4, %v800_v36  ;;  %v931_v63 = vsel %vm771_vm0, %v590_v41, 0.0  ;;  %v997_v0 = vadd.f32 %v996_v44, %v995_v37  ;;  %v1054_v1 = vadd.f32 %v1053_v45, %v1052_v52  ;;  %v651_v29 = vld [vmem:[%s4550_s0 + $0x440] sm:$0xff]  ;;  %v592_v35 = vld [vmem:[%s4550_s0 + $0x268] sm:$0xff]  ;;  %v569_v39 = vld [vmem:[%s4550_s0 + $0x1b0] sm:$0xff] }
  0x8f   : > { %v3552_v5 = vsel %vm771_vm0, %v542_v40, 0.0  ;;  %v3555_v6 = vsel %vm771_vm0, %v543_v46, 0.0  ;;  %v998_v4 = vsel %vm771_vm0, %v621_v47, 0.0  ;;  %v1057_v7 = vsel %vm771_vm0, %v648_v48, 0.0  ;;  %v623_v40 = vld [vmem:[%s4550_s0 + $0x360] sm:$0xff]  ;;  %v652_v41 = vld [vmem:[%s4550_s0 + $0x448] sm:$0xff] }
  0x90   : > { %v3569_v12 = vsel %vm771_vm0, %v544_v53, 0.0  ;;  %v3572_v13 = vsel %vm771_vm0, %v545_v54, 0.0  ;;  %v867_v14 = vadd.f32 %v866_v56, %v865_v51  ;;  %v1056_v15 = vadd.f32 %v1055_v58, %v1054_v1  ;;  %v570_v48 = vld [vmem:[%s4550_s0 + $0x1b8] sm:$0xff]  ;;  %v571_v51 = vld [vmem:[%s4550_s0 + $0x1c0] sm:$0xff]  ;;  %v573_v58 = vld [vmem:[%s4550_s0 + $0x1d0] sm:$0xff] }
  0x91   : > { %v3581_v21 = vsel %vm771_vm0, %v546_v59, 0.0  ;;  %v868_v22 = vsel %vm771_vm0, %v561_v60, 0.0  ;;  %v932_v25 = vadd.f32 %v931_v63, %v930_v57  ;;  %v1059_v26 = vsel %vm771_vm0, %v649_v61, 0.0  ;;  %v572_v57 = vld [vmem:[%s4550_s0 + $0x1c8] sm:$0xff]  ;;  %v653_v59 = vld [vmem:[%s4550_s0 + $0x450] sm:$0xff] }
  0x92   : > { %v804_v30 = vadd.f32 %v3441_v11, %v802_v62  ;;  %v933_v31 = vsel %vm771_vm0, %v591_v3, 0.0  ;;  %v999_v32 = vadd.f32 %v998_v4, %v997_v0  ;;  %v1058_v33 = vadd.f32 %v1057_v7, %v1056_v15  ;;  %v574_v0 = vld [vmem:[%s4550_s0 + $0x1d8] sm:$0xff]  ;;  %v593_v1 = vld [vmem:[%s4550_s0 + $0x270] sm:$0xff]  ;;  %v575_v7 = vld [vmem:[%s4550_s0 + $0x1e0] sm:$0xff] }
  0x93   : > { %v870_v36 = vsel %vm771_vm0, %v562_v2, 0.0  ;;  %v872_v37 = vsel %vm771_vm0, %v563_v8, 0.0  ;;  %v1000_v38 = vsel %vm771_vm0, %v622_v9, 0.0  ;;  %v1061_v11 = vsel %vm771_vm0, %v650_v10, 0.0  ;;  %v624_v8 = vld [vmem:[%s4550_s0 + $0x368] sm:$0xff]  ;;  %v654_v9 = vld [vmem:[%s4550_s0 + $0x458] sm:$0xff] }
  0x94   : > { %v869_v44 = vadd.f32 %v868_v22, %v867_v14  ;;  %v3616_v45 = vsel %vm771_vm0, %v564_v19, 0.0  ;;  %v3619_v46 = vsel %vm771_vm0, %v565_v20, 0.0  ;;  %v1060_v47 = vadd.f32 %v1059_v26, %v1058_v33  ;;  %v576_v20 = vld [vmem:[%s4550_s0 + $0x1e8] sm:$0xff]  ;;  %v577_v22 = vld [vmem:[%s4550_s0 + $0x1f0] sm:$0xff] }
  0x95   : > { %v3628_v52 = vsel %vm771_vm0, %v566_v27, 0.0  ;;  %v3631_v53 = vsel %vm771_vm0, %v567_v28, 0.0  ;;  %v934_v54 = vadd.f32 %v933_v31, %v932_v25  ;;  %v1063_v56 = vsel %vm771_vm0, %v651_v29, 0.0  ;;  %v578_v29 = vld [vmem:[%s4550_s0 + $0x1f8] sm:$0xff]  ;;  %v655_v31 = vld [vmem:[%s4550_s0 + $0x460] sm:$0xff] }
  0x96   : > { %v806_v60 = vadd.f32 %v3451_v16, %v804_v30  ;;  %v935_v61 = vsel %vm771_vm0, %v592_v35, 0.0  ;;  %v1001_v62 = vadd.f32 %v1000_v38, %v999_v32  ;;  %v1062_v63 = vadd.f32 %v1061_v11, %v1060_v47  ;;  %v594_v30 = vld [vmem:[%s4550_s0 + $0x278] sm:$0xff]  ;;  %v675_v38 = vld [vmem:[%s4550_s0 + $0x500] sm:$0xff]  ;;  %v677_v47 = vld [vmem:[%s4550_s0 + $0x510] sm:$0xff] }
  0x97   : > { %v3652_v2 = vsel %vm771_vm0, %v568_v34, 0.0  ;;  %v3655_v3 = vsel %vm771_vm0, %v569_v39, 0.0  ;;  %v1002_v16 = vsel %vm771_vm0, %v623_v40, 0.0  ;;  %v1065_v4 = vsel %vm771_vm0, %v652_v41, 0.0  ;;  %v656_v41 = vld [vmem:[%s4550_s0 + $0x468] sm:$0xff] }
  0x98   : > { %v871_v10 = vadd.f32 %v870_v36, %v869_v44  ;;  %v3669_v14 = vsel %vm771_vm0, %v570_v48, 0.0  ;;  %v3672_v15 = vsel %vm771_vm0, %v571_v51, 0.0  ;;  %v1064_v19 = vadd.f32 %v1063_v56, %v1062_v63  ;;  %v625_v36 = vld [vmem:[%s4550_s0 + $0x370] sm:$0xff]  ;;  %v676_v44 = vld [vmem:[%s4550_s0 + $0x508] sm:$0xff]  ;;  %v678_v63 = vld [vmem:[%s4550_s0 + $0x518] sm:$0xff] }
  0x99   : > { %v3681_v25 = vsel %vm771_vm0, %v572_v57, 0.0  ;;  %v3684_v26 = vsel %vm771_vm0, %v573_v58, 0.0  ;;  %v936_v27 = vadd.f32 %v935_v61, %v934_v54  ;;  %v1067_v28 = vsel %vm771_vm0, %v653_v59, 0.0  ;;  %v595_v57 = vld [vmem:[%s4550_s0 + $0x280] sm:$0xff] }
  0x9a   : > { %v808_v32 = vadd.f32 %v3454_v17, %v806_v60  ;;  %v937_v33 = vsel %vm771_vm0, %v593_v1, 0.0  ;;  %v1003_v34 = vadd.f32 %v1002_v16, %v1001_v62  ;;  %v1066_v35 = vadd.f32 %v1065_v4, %v1064_v19  ;;  %v597_v62 = vld [vmem:[%s4550_s0 + $0x290] sm:$0xff] }
  0x9b   : > { %v3705_v11 = vsel %vm771_vm0, %v574_v0, 0.0  ;;  %v3708_v39 = vsel %vm771_vm0, %v575_v7, 0.0  ;;  %v1004_v17 = vsel %vm771_vm0, %v624_v8, 0.0  ;;  %v1069_v40 = vsel %vm771_vm0, %v654_v9, 0.0  ;;  %v657_v7 = vld [vmem:[%s4550_s0 + $0x470] sm:$0xff] }
  0x9c   : > { %v873_v48 = vadd.f32 %v872_v37, %v871_v10  ;;  %v3722_v51 = vsel %vm771_vm0, %v576_v20, 0.0  ;;  %v3725_v54 = vsel %vm771_vm0, %v577_v22, 0.0  ;;  %v1068_v56 = vadd.f32 %v1067_v28, %v1066_v35  ;;  %v596_v37 = vld [vmem:[%s4550_s0 + $0x288] sm:$0xff]  ;;  %v626_v20 = vld [vmem:[%s4550_s0 + $0x378] sm:$0xff]  ;;  %v679_v22 = vld [vmem:[%s4550_s0 + $0x520] sm:$0xff] }
  0x9d   : > { %v3731_v58 = vsel %vm771_vm0, %v578_v29, 0.0  ;;  %v938_v59 = vadd.f32 %v937_v33, %v936_v27  ;;  %v939_v60 = vsel %vm771_vm0, %v594_v30, 0.0  ;;  %v1071_v61 = vsel %vm771_vm0, %v655_v31, 0.0  ;;  %v599_v31 = vld [vmem:[%s4550_s0 + $0x2a0] sm:$0xff] }
  0x9e   : > { %4584 = vst [vmem:[#allocation21_spill] sm:$0xff] %v3731_v58  ;;  %v810_v0 = vadd.f32 %v3457_v18, %v808_v32  ;;  %v1005_v1 = vadd.f32 %v1004_v17, %v1003_v34  ;;  %v1070_v16 = vadd.f32 %v1069_v40, %v1068_v56  ;;  %v1117_v4 = vsel %vm771_vm0, %v675_v38, 0.0  ;;  %v598_v18 = vld [vmem:[%s4550_s0 + $0x298] sm:$0xff]  ;;  %v600_v32 = vld [vmem:[%s4550_s0 + $0x2a8] sm:$0xff] }
  0x9f   : > { %v1006_v8 = vsel %vm771_vm0, %v625_v36, 0.0  ;;  %v1073_v9 = vsel %vm771_vm0, %v656_v41, 0.0  ;;  %v1118_v10 = vsel %vm771_vm0, %v676_v44, 0.0  ;;  %v1120_v19 = vsel %vm771_vm0, %v677_v47, 0.0  ;;  %v601_v36 = vld [vmem:[%s4550_s0 + $0x2b0] sm:$0xff]  ;;  %v680_v38 = vld [vmem:[%s4550_s0 + $0x528] sm:$0xff] }
  0xa0   : > { %v875_v27 = vadd.f32 %v3616_v45, %v873_v48  ;;  %v941_v28 = vsel %vm771_vm0, %v595_v57, 0.0  ;;  %v1072_v29 = vadd.f32 %v1071_v61, %v1070_v16  ;;  %v1119_v30 = vadd.f32 %v1118_v10, %v1117_v4  ;;  %v602_v47 = vld [vmem:[%s4550_s0 + $0x2b8] sm:$0xff]  ;;  %v603_v61 = vld [vmem:[%s4550_s0 + $0x2c0] sm:$0xff]  ;;  %v604_v16 = vld [vmem:[%s4550_s0 + $0x2c8] sm:$0xff] }
  0xa1   : > { %v940_v33 = vadd.f32 %v939_v60, %v938_v59  ;;  %v943_v34 = vsel %vm771_vm0, %v596_v37, 0.0  ;;  %v3772_v35 = vsel %vm771_vm0, %v597_v62, 0.0  ;;  %v1122_v45 = vsel %vm771_vm0, %v678_v63, 0.0  ;;  %v658_v48 = vld [vmem:[%s4550_s0 + $0x478] sm:$0xff]  ;;  %v627_v37 = vld [vmem:[%s4550_s0 + $0x380] sm:$0xff]  ;;  %v681_v62 = vld [vmem:[%s4550_s0 + $0x530] sm:$0xff] }
  0xa2   : > { %v1007_v17 = vadd.f32 %v1006_v8, %v1005_v1  ;;  %v1074_v40 = vadd.f32 %v1073_v9, %v1072_v29  ;;  %v1075_v41 = vsel %vm771_vm0, %v657_v7, 0.0  ;;  %v1121_v44 = vadd.f32 %v1120_v19, %v1119_v30  ;;  %v605_v4 = vld [vmem:[%s4550_s0 + $0x2d0] sm:$0xff]  ;;  %v606_v10 = vld [vmem:[%s4550_s0 + $0x2d8] sm:$0xff]  ;;  %v659_v29 = vld [vmem:[%s4550_s0 + $0x480] sm:$0xff] }
  0xa3   : > { %v812_v56 = vadd.f32 %v3470_v23, %v810_v0  ;;  %v3790_v57 = vsel %vm771_vm0, %v598_v18, 0.0  ;;  %v1008_v59 = vsel %vm771_vm0, %v626_v20, 0.0  ;;  %v1124_v60 = vsel %vm771_vm0, %v679_v22, 0.0  ;;  %v682_v19 = vld [vmem:[%s4550_s0 + $0x538] sm:$0xff] }
  0xa4   : > { %v877_v23 = vadd.f32 %v3619_v46, %v875_v27  ;;  %v3805_v63 = vsel %vm771_vm0, %v599_v31, 0.0  ;;  %v3808_v0 = vsel %vm771_vm0, %v600_v32, 0.0  ;;  %v1123_v1 = vadd.f32 %v1122_v45, %v1121_v44  ;;  %v608_v45 = vld [vmem:[%s4550_s0 + $0x2e8] sm:$0xff]  ;;  %v609_v44 = vld [vmem:[%s4550_s0 + $0x2f0] sm:$0xff]  ;;  %v690_v58 = vld [vmem:[%s4550_s0 + $0x578] sm:$0xff] }
  0xa5   : > { %v942_v7 = vadd.f32 %v941_v28, %v940_v33  ;;  %v3817_v8 = vsel %vm771_vm0, %v601_v36, 0.0  ;;  %v1076_v46 = vadd.f32 %v1075_v41, %v1074_v40  ;;  %v1126_v9 = vsel %vm771_vm0, %v680_v38, 0.0  ;;  %v607_v28 = vld [vmem:[%s4550_s0 + $0x2e0] sm:$0xff]  ;;  %v628_v36 = vld [vmem:[%s4550_s0 + $0x388] sm:$0xff] }
  0xa6   : > { %v3827_v18 = vsel %vm771_vm0, %v602_v47, 0.0  ;;  %v1009_v20 = vadd.f32 %v1008_v59, %v1007_v17  ;;  %v1077_v22 = vsel %vm771_vm0, %v658_v48, 0.0  ;;  %v1125_v27 = vadd.f32 %v1124_v60, %v1123_v1  ;;  %v683_v38 = vld [vmem:[%s4550_s0 + $0x540] sm:$0xff]  ;;  %v610_v47 = vld [vmem:[%s4550_s0 + $0x2f8] sm:$0xff]  ;;  %v629_v60 = vld [vmem:[%s4550_s0 + $0x390] sm:$0xff] }
  0xa7   : > { %v814_v30 = vadd.f32 %v3473_v24, %v812_v56  ;;  %v3838_v31 = vsel %vm771_vm0, %v603_v61, 0.0  ;;  %v1010_v32 = vsel %vm771_vm0, %v627_v37, 0.0  ;;  %v1128_v33 = vsel %vm771_vm0, %v681_v62, 0.0  ;;  %v684_v61 = vld [vmem:[%s4550_s0 + $0x548] sm:$0xff]  ;;  %v630_v1 = vld [vmem:[%s4550_s0 + $0x398] sm:$0xff] }
  0xa8   : > { %v879_v24 = vadd.f32 %v3628_v52, %v877_v23  ;;  %v3853_v17 = vsel %vm771_vm0, %v604_v16, 0.0  ;;  %v3856_v40 = vsel %vm771_vm0, %v605_v4, 0.0  ;;  %v1127_v41 = vadd.f32 %v1126_v9, %v1125_v27  ;;  %v660_v16 = vld [vmem:[%s4550_s0 + $0x488] sm:$0xff] }
  0xa9   : > { %v944_v48 = vadd.f32 %v943_v34, %v942_v7  ;;  %v3865_v56 = vsel %vm771_vm0, %v606_v10, 0.0  ;;  %v1078_v52 = vadd.f32 %v1077_v22, %v1076_v46  ;;  %v1130_v59 = vsel %vm771_vm0, %v682_v19, 0.0  ;;  %v631_v10 = vld [vmem:[%s4550_s0 + $0x3a0] sm:$0xff]  ;;  %v632_v19 = vld [vmem:[%s4550_s0 + $0x3a8] sm:$0xff] }
  0xaa   : > { %v3875_v37 = vsel %vm771_vm0, %v607_v28, 0.0  ;;  %v1011_v62 = vadd.f32 %v1010_v32, %v1009_v20  ;;  %v1079_v34 = vsel %vm771_vm0, %v659_v29, 0.0  ;;  %v1129_v23 = vadd.f32 %v1128_v33, %v1127_v41  ;;  %v685_v20 = vld [vmem:[%s4550_s0 + $0x550] sm:$0xff] }
  0xab   : > { %v816_v4 = vadd.f32 %v3502_v42, %v814_v30  ;;  %v3886_v7 = vsel %vm771_vm0, %v608_v45, 0.0  ;;  %v1012_v46 = vsel %vm771_vm0, %v628_v36, 0.0  ;;  %v1132_v9 = vsel %vm771_vm0, %v683_v38, 0.0  ;;  %v633_v29 = vld [vmem:[%s4550_s0 + $0x3b0] sm:$0xff]  ;;  %v634_v30 = vld [vmem:[%s4550_s0 + $0x3b8] sm:$0xff]  ;;  %v635_v36 = vld [vmem:[%s4550_s0 + $0x3c0] sm:$0xff] }
  0xac   : > { %v881_v42 = vadd.f32 %v3631_v53, %v879_v24  ;;  %v3901_v22 = vsel %vm771_vm0, %v609_v44, 0.0  ;;  %v3904_v27 = vsel %vm771_vm0, %v610_v47, 0.0  ;;  %v1131_v28 = vadd.f32 %v1130_v59, %v1129_v23  ;;  %v686_v38 = vld [vmem:[%s4550_s0 + $0x558] sm:$0xff]  ;;  %v708_v23 = vld [vmem:[%s4550_s0 + $0x608] sm:$0xff] }
  0xad   : > { %4585 = vst [vmem:[#allocation22_spill] sm:$0xff] %v3904_v27  ;;  %v946_v32 = vadd.f32 %v3772_v35, %v944_v48  ;;  %v1014_v33 = vsel %vm771_vm0, %v629_v60, 0.0  ;;  %v1080_v53 = vadd.f32 %v1079_v34, %v1078_v52  ;;  %v1134_v45 = vsel %vm771_vm0, %v684_v61, 0.0  ;;  %v636_v35 = vld [vmem:[%s4550_s0 + $0x3c8] sm:$0xff]  ;;  %v661_v48 = vld [vmem:[%s4550_s0 + $0x490] sm:$0xff]  ;;  %v707_v52 = vld [vmem:[%s4550_s0 + $0x600] sm:$0xff] }
  0xae   : > { %v1013_v24 = vadd.f32 %v1012_v46, %v1011_v62  ;;  %v1016_v41 = vsel %vm771_vm0, %v630_v1, 0.0  ;;  %v1081_v44 = vsel %vm771_vm0, %v660_v16, 0.0  ;;  %v1133_v47 = vadd.f32 %v1132_v9, %v1131_v28  ;;  %v687_v34 = vld [vmem:[%s4550_s0 + $0x560] sm:$0xff]  ;;  %v688_v28 = vld [vmem:[%s4550_s0 + $0x568] sm:$0xff] }
  0xaf   : > { %v818_v59 = vadd.f32 %v3505_v43, %v816_v4  ;;  %v3934_v60 = vsel %vm771_vm0, %v631_v10, 0.0  ;;  %v3937_v61 = vsel %vm771_vm0, %v632_v19, 0.0  ;;  %v1136_v62 = vsel %vm771_vm0, %v685_v20, 0.0  ;;  %v709_v43 = vld [vmem:[%s4550_s0 + $0x610] sm:$0xff] }
  0xb0   : > { %v883_v1 = vadd.f32 %v3652_v2, %v881_v42  ;;  %v3951_v16 = vsel %vm771_vm0, %v633_v29, 0.0  ;;  %v3954_v4 = vsel %vm771_vm0, %v634_v30, 0.0  ;;  %v1135_v46 = vadd.f32 %v1134_v45, %v1133_v47  ;;  %v710_v2 = vld [vmem:[%s4550_s0 + $0x618] sm:$0xff]  ;;  %v711_v47 = vld [vmem:[%s4550_s0 + $0x620] sm:$0xff] }
  0xb1   : > { %v948_v9 = vadd.f32 %v3790_v57, %v946_v32  ;;  %v3958_v10 = vsel %vm771_vm0, %v635_v36, 0.0  ;;  %v1082_v19 = vadd.f32 %v1081_v44, %v1080_v53  ;;  %v1138_v20 = vsel %vm771_vm0, %v686_v38, 0.0  ;;  %v637_v32 = vld [vmem:[%s4550_s0 + $0x3d0] sm:$0xff]  ;;  %v662_v53 = vld [vmem:[%s4550_s0 + $0x498] sm:$0xff] }
  0xb2   : > { %v1015_v42 = vadd.f32 %v1014_v33, %v1013_v24  ;;  %v1083_v29 = vsel %vm771_vm0, %v661_v48, 0.0  ;;  %v1137_v30 = vadd.f32 %v1136_v62, %v1135_v46  ;;  %v1186_v57 = vsel %vm771_vm0, %v707_v52, 0.0  ;;  %v638_v24 = vld [vmem:[%s4550_s0 + $0x3d8] sm:$0xff]  ;;  %v689_v44 = vld [vmem:[%s4550_s0 + $0x570] sm:$0xff] }
  0xb3   : > { %v3976_v45 = vsel %vm771_vm0, %v636_v35, 0.0  ;;  %v1140_v36 = vsel %vm771_vm0, %v687_v34, 0.0  ;;  %v1187_v33 = vsel %vm771_vm0, %v708_v23, 0.0  ;;  %v1189_v38 = vsel %vm771_vm0, %v709_v43, 0.0  ;;  %v639_v34 = vld [vmem:[%s4550_s0 + $0x3e0] sm:$0xff] }
  0xb4   : > { %v820_v35 = vadd.f32 %v3519_v49, %v818_v59  ;;  %v885_v48 = vadd.f32 %v3655_v3, %v883_v1  ;;  %v1139_v52 = vadd.f32 %v1138_v20, %v1137_v30  ;;  %v1188_v62 = vadd.f32 %v1187_v33, %v1186_v57  ;;  %v712_v49 = vld [vmem:[%s4550_s0 + $0x628] sm:$0xff] }
  0xb5   : > { %v950_v23 = vadd.f32 %v3805_v63, %v948_v9  ;;  %v1084_v43 = vadd.f32 %v1083_v29, %v1082_v19  ;;  %v1142_v46 = vsel %vm771_vm0, %v688_v28, 0.0  ;;  %v1191_v27 = vsel %vm771_vm0, %v710_v2, 0.0  ;;  %v663_v63 = vld [vmem:[%s4550_s0 + $0x4a0] sm:$0xff]  ;;  %v713_v29 = vld [vmem:[%s4550_s0 + $0x630] sm:$0xff] }
  0xb6   : > { %v1017_v3 = vadd.f32 %v1016_v41, %v1015_v42  ;;  %v1085_v59 = vsel %vm771_vm0, %v662_v53, 0.0  ;;  %v1141_v1 = vadd.f32 %v1140_v36, %v1139_v52  ;;  %v1190_v20 = vadd.f32 %v1189_v38, %v1188_v62  ;;  %v640_v41 = vld [vmem:[%s4550_s0 + $0x3e8] sm:$0xff]  ;;  %v691_v42 = vld [vmem:[%s4550_s0 + $0x580] sm:$0xff]  ;;  %v641_v36 = vld [vmem:[%s4550_s0 + $0x3f0] sm:$0xff] }
  0xb7   : > { %v4009_v9 = vsel %vm771_vm0, %v637_v32, 0.0  ;;  %v4012_v19 = vsel %vm771_vm0, %v638_v24, 0.0  ;;  %v1144_v28 = vsel %vm771_vm0, %v689_v44, 0.0  ;;  %v1193_v2 = vsel %vm771_vm0, %v711_v47, 0.0  ;;  %v714_v47 = vld [vmem:[%s4550_s0 + $0x638] sm:$0xff] }
  0xb8   : > { %v887_v30 = vadd.f32 %v3669_v14, %v885_v48  ;;  %v4027_v57 = vsel %vm771_vm0, %v639_v34, 0.0  ;;  %v1143_v32 = vadd.f32 %v1142_v46, %v1141_v1  ;;  %v1192_v53 = vadd.f32 %v1191_v27, %v1190_v20  ;;  %v692_v14 = vld [vmem:[%s4550_s0 + $0x588] sm:$0xff]  ;;  %v693_v46 = vld [vmem:[%s4550_s0 + $0x590] sm:$0xff] }
  0xb9   : > { %v952_v33 = vadd.f32 %v3808_v0, %v950_v23  ;;  %v1086_v38 = vadd.f32 %v1085_v59, %v1084_v43  ;;  %v1146_v24 = vsel %vm771_vm0, %v690_v58, 0.0  ;;  %v1195_v44 = vsel %vm771_vm0, %v712_v49, 0.0  ;;  %v664_v58 = vld [vmem:[%s4550_s0 + $0x4a8] sm:$0xff]  ;;  %v715_v49 = vld [vmem:[%s4550_s0 + $0x640] sm:$0xff]  ;;  %v665_v1 = vld [vmem:[%s4550_s0 + $0x4b0] sm:$0xff] }
  0xba   : > { %v1019_v27 = vadd.f32 %v3934_v60, %v1017_v3  ;;  %v1087_v48 = vsel %vm771_vm0, %v663_v63, 0.0  ;;  %v1145_v52 = vadd.f32 %v1144_v28, %v1143_v32  ;;  %v1194_v62 = vadd.f32 %v1193_v2, %v1192_v53  ;;  %v642_v60 = vld [vmem:[%s4550_s0 + $0x3f8] sm:$0xff]  ;;  %v717_v53 = vld [vmem:[%s4550_s0 + $0x650] sm:$0xff] }
  0xbb   : > { %v822_v0 = vadd.f32 %v3522_v50, %v820_v35  ;;  %v4048_v34 = vsel %vm771_vm0, %v640_v41, 0.0  ;;  %v1148_v23 = vsel %vm771_vm0, %v691_v42, 0.0  ;;  %v1197_v43 = vsel %vm771_vm0, %v713_v29, 0.0  ;;  %v716_v41 = vld [vmem:[%s4550_s0 + $0x648] sm:$0xff] }
  0xbc   : > { %v889_v50 = vadd.f32 %v3672_v15, %v887_v30  ;;  %v4063_v35 = vsel %vm771_vm0, %v641_v36, 0.0  ;;  %v1147_v3 = vadd.f32 %v1146_v24, %v1145_v52  ;;  %v1196_v59 = vadd.f32 %v1195_v44, %v1194_v62  ;;  %v694_v15 = vld [vmem:[%s4550_s0 + $0x598] sm:$0xff]  ;;  %v739_v24 = vld [vmem:[%s4550_s0 + $0x700] sm:$0xff]  ;;  %v740_v44 = vld [vmem:[%s4550_s0 + $0x708] sm:$0xff] }
  0xbd   : > { %v954_v20 = vadd.f32 %v3817_v8, %v952_v33  ;;  %v1088_v63 = vadd.f32 %v1087_v48, %v1086_v38  ;;  %v1150_v28 = vsel %vm771_vm0, %v692_v14, 0.0  ;;  %v1199_v2 = vsel %vm771_vm0, %v714_v47, 0.0  ;;  %v695_v8 = vld [vmem:[%s4550_s0 + $0x5a0] sm:$0xff]  ;;  %v666_v52 = vld [vmem:[%s4550_s0 + $0x4b8] sm:$0xff] }
  0xbe   : > { %v1021_v42 = vadd.f32 %v3937_v61, %v1019_v27  ;;  %v1089_v29 = vsel %vm771_vm0, %v664_v58, 0.0  ;;  %v1149_v30 = vadd.f32 %v1148_v23, %v1147_v3  ;;  %v1198_v32 = vadd.f32 %v1197_v43, %v1196_v59  ;;  %v718_v43 = vld [vmem:[%s4550_s0 + $0x658] sm:$0xff] }
  0xbf   : > { %v4086_v36 = vadd.f32 %v3531_v55, %v822_v0  ;;  %v4089_v33 = vsel %vm771_vm0, %v642_v60, 0.0  ;;  %v1152_v61 = vsel %vm771_vm0, %v693_v46, 0.0  ;;  %v1201_v38 = vsel %vm771_vm0, %v715_v49, 0.0  ;;  %v741_v55 = vld [vmem:[%s4550_s0 + $0x710] sm:$0xff]  ;;  %v742_v60 = vld [vmem:[%s4550_s0 + $0x718] sm:$0xff] }
  0xc0   : > { %v4103_v14 = vadd.f32 %v3681_v25, %v889_v50  ;;  %v1091_v47 = vsel %vm771_vm0, %v665_v1, 0.0  ;;  %v1151_v27 = vadd.f32 %v1150_v28, %v1149_v30  ;;  %v1200_v48 = vadd.f32 %v1199_v2, %v1198_v32  ;;  %v696_v25 = vld [vmem:[%s4550_s0 + $0x5a8] sm:$0xff]  ;;  %v743_v28 = vld [vmem:[%s4550_s0 + $0x720] sm:$0xff] }
  0xc1   : > { %v956_v62 = vadd.f32 %v3827_v18, %v954_v20  ;;  %v1090_v58 = vadd.f32 %v1089_v29, %v1088_v63  ;;  %v1154_v0 = vsel %vm771_vm0, %v694_v15, 0.0  ;;  %v1203_v23 = vsel %vm771_vm0, %v716_v41, 0.0  ;;  %v697_v63 = vld [vmem:[%s4550_s0 + $0x5b0] sm:$0xff]  ;;  %v667_v29 = vld [vmem:[%s4550_s0 + $0x4c0] sm:$0xff] }
  0xc2   : > { %v1023_v46 = vadd.f32 %v3951_v16, %v1021_v42  ;;  %v1153_v18 = vadd.f32 %v1152_v61, %v1151_v27  ;;  %v1156_v49 = vsel %vm771_vm0, %v695_v8, 0.0  ;;  %v1202_v50 = vadd.f32 %v1201_v38, %v1200_v48  ;;  %v719_v16 = vld [vmem:[%s4550_s0 + $0x660] sm:$0xff]  ;;  %v698_v61 = vld [vmem:[%s4550_s0 + $0x5b8] sm:$0xff]  ;;  %v720_v38 = vld [vmem:[%s4550_s0 + $0x668] sm:$0xff] }
  0xc3   : > { %v1205_v3 = vsel %vm771_vm0, %v717_v53, 0.0  ;;  %v1255_v59 = vsel %vm771_vm0, %v739_v24, 0.0  ;;  %v1256_v1 = vsel %vm771_vm0, %v740_v44, 0.0  ;;  %v1258_v20 = vsel %vm771_vm0, %v741_v55, 0.0  ;;  %v744_v24 = vld [vmem:[%s4550_s0 + $0x728] sm:$0xff] }
  0xc4   : > { %v1093_v2 = vsel %vm771_vm0, %v666_v52, 0.0  ;;  %v1155_v15 = vadd.f32 %v1154_v0, %v1153_v18  ;;  %v1204_v41 = vadd.f32 %v1203_v23, %v1202_v50  ;;  %v1257_v42 = vadd.f32 %v1256_v1, %v1255_v59  ;;  %v721_v23 = vld [vmem:[%s4550_s0 + $0x670] sm:$0xff]  ;;  %v699_v50 = vld [vmem:[%s4550_s0 + $0x5c0] sm:$0xff]  ;;  %v746_v59 = vld [vmem:[%s4550_s0 + $0x738] sm:$0xff] }
  0xc5   : > { %v1092_v30 = vadd.f32 %v1091_v47, %v1090_v58  ;;  %v1158_v32 = vsel %vm771_vm0, %v696_v25, 0.0  ;;  %v1207_v8 = vsel %vm771_vm0, %v718_v43, 0.0  ;;  %v1260_v53 = vsel %vm771_vm0, %v742_v60, 0.0  ;;  %v745_v25 = vld [vmem:[%s4550_s0 + $0x730] sm:$0xff] }
  0xc6   : > { %v1025_v44 = vadd.f32 %v3954_v4, %v1023_v46  ;;  %v1157_v55 = vadd.f32 %v1156_v49, %v1155_v15  ;;  %v1206_v47 = vadd.f32 %v1205_v3, %v1204_v41  ;;  %v1259_v27 = vadd.f32 %v1258_v20, %v1257_v42  ;;  %v722_v3 = vld [vmem:[%s4550_s0 + $0x678] sm:$0xff] }
  0xc7   : > { %v958_v48 = vadd.f32 %v3838_v31, %v956_v62  ;;  %v1160_v52 = vsel %vm771_vm0, %v697_v63, 0.0  ;;  %v1209_v58 = vsel %vm771_vm0, %v719_v16, 0.0  ;;  %v1262_v0 = vsel %vm771_vm0, %v743_v28, 0.0  ;;  %v668_v28 = vld [vmem:[%s4550_s0 + $0x4c8] sm:$0xff] }
  0xc8   : > { %v1095_v4 = vsel %vm771_vm0, %v667_v29, 0.0  ;;  %v1159_v43 = vadd.f32 %v1158_v32, %v1157_v55  ;;  %v1208_v60 = vadd.f32 %v1207_v8, %v1206_v47  ;;  %v1261_v46 = vadd.f32 %v1260_v53, %v1259_v27  ;;  %v747_v29 = vld [vmem:[%s4550_s0 + $0x740] sm:$0xff]  ;;  %v669_v27 = vld [vmem:[%s4550_s0 + $0x4d0] sm:$0xff] }
  0xc9   : > { %v1094_v31 = vadd.f32 %v1093_v2, %v1092_v30  ;;  %v1162_v62 = vsel %vm771_vm0, %v698_v61, 0.0  ;;  %v1211_v18 = vsel %vm771_vm0, %v720_v38, 0.0  ;;  %v1264_v49 = vsel %vm771_vm0, %v744_v24, 0.0  ;;  %v700_v38 = vld [vmem:[%s4550_s0 + $0x5c8] sm:$0xff] }
  0xca   : > { %v1027_v1 = vadd.f32 %v3958_v10, %v1025_v44  ;;  %v1161_v20 = vadd.f32 %v1160_v52, %v1159_v43  ;;  %v1210_v63 = vadd.f32 %v1209_v58, %v1208_v60  ;;  %v1263_v16 = vadd.f32 %v1262_v0, %v1261_v46  ;;  %v723_v10 = vld [vmem:[%s4550_s0 + $0x680] sm:$0xff]  ;;  %v724_v24 = vld [vmem:[%s4550_s0 + $0x688] sm:$0xff] }
  0xcb   : > { %v826_v2 = vadd.f32 %v3552_v5, %v4086_v36  ;;  %v960_v15 = vadd.f32 %v3853_v17, %v958_v48  ;;  %v1213_v41 = vsel %vm771_vm0, %v721_v23, 0.0  ;;  %v1266_v42 = vsel %vm771_vm0, %v745_v25, 0.0  ;;  %v749_v23 = vld [vmem:[%s4550_s0 + $0x750] sm:$0xff] }
  0xcc   : > { %v893_v30 = vadd.f32 %v3684_v26, %v4103_v14  ;;  %v1163_v32 = vadd.f32 %v1162_v62, %v1161_v20  ;;  %v1212_v8 = vadd.f32 %v1211_v18, %v1210_v63  ;;  %v1265_v5 = vadd.f32 %v1264_v49, %v1263_v16  ;;  %v748_v26 = vld [vmem:[%s4550_s0 + $0x748] sm:$0xff]  ;;  %v701_v62 = vld [vmem:[%s4550_s0 + $0x5d0] sm:$0xff]  ;;  %v726_v18 = vld [vmem:[%s4550_s0 + $0x698] sm:$0xff] }
  0xcd   : > { %v1096_v36 = vadd.f32 %v1095_v4, %v1094_v31  ;;  %v1164_v17 = vsel %vm771_vm0, %v699_v50, 0.0  ;;  %v1215_v53 = vsel %vm771_vm0, %v722_v3, 0.0  ;;  %v1268_v61 = vsel %vm771_vm0, %v746_v59, 0.0 }
  0xce   : > { %v1029_v14 = vadd.f32 %v3976_v45, %v1027_v1  ;;  %v1097_v44 = vsel %vm771_vm0, %v668_v28, 0.0  ;;  %v1214_v55 = vadd.f32 %v1213_v41, %v1212_v8  ;;  %v1267_v47 = vadd.f32 %v1266_v42, %v1265_v5  ;;  %v725_v45 = vld [vmem:[%s4550_s0 + $0x690] sm:$0xff]  ;;  %v670_v1 = vld [vmem:[%s4550_s0 + $0x4d8] sm:$0xff]  ;;  %v728_v8 = vld [vmem:[%s4550_s0 + $0x6a8] sm:$0xff] }
  0xcf   : > { %v828_v48 = vadd.f32 %v3555_v6, %v826_v2  ;;  %v962_v52 = vadd.f32 %v3856_v40, %v960_v15  ;;  %v1217_v58 = vsel %vm771_vm0, %v723_v10, 0.0  ;;  %v1270_v0 = vsel %vm771_vm0, %v747_v29, 0.0  ;;  %v751_v2 = vld [vmem:[%s4550_s0 + $0x760] sm:$0xff] }
  0xd0   : > { %v895_v25 = vadd.f32 %v3705_v11, %v893_v30  ;;  %v1165_v4 = vadd.f32 %v1164_v17, %v1163_v32  ;;  %v1216_v43 = vadd.f32 %v1215_v53, %v1214_v55  ;;  %v1269_v60 = vadd.f32 %v1268_v61, %v1267_v47  ;;  %v750_v11 = vld [vmem:[%s4550_s0 + $0x758] sm:$0xff]  ;;  %v671_v61 = vld [vmem:[%s4550_s0 + $0x4e0] sm:$0xff] }
  0xd1   : > { %v1098_v6 = vadd.f32 %v1097_v44, %v1096_v36  ;;  %v1166_v40 = vsel %vm771_vm0, %v700_v38, 0.0  ;;  %v1219_v46 = vsel %vm771_vm0, %v724_v24, 0.0  ;;  %v1272_v31 = vsel %vm771_vm0, %v748_v26, 0.0  ;;  %v702_v32 = vld [vmem:[%s4550_s0 + $0x5d8] sm:$0xff] }
  0xd2   : > { %v1031_v49 = vadd.f32 %v4009_v9, %v1029_v14  ;;  %v1099_v50 = vsel %vm771_vm0, %v669_v27, 0.0  ;;  %v1218_v3 = vadd.f32 %v1217_v58, %v1216_v43  ;;  %v1271_v59 = vadd.f32 %v1270_v0, %v1269_v60  ;;  %v727_v9 = vld [vmem:[%s4550_s0 + $0x6a0] sm:$0xff]  ;;  %v729_v14 = vld [vmem:[%s4550_s0 + $0x6b0] sm:$0xff] }
  0xd3   : > { %v830_v20 = vadd.f32 %v3569_v12, %v828_v48  ;;  %v964_v63 = vadd.f32 %v3865_v56, %v962_v52  ;;  %v1221_v16 = vsel %vm771_vm0, %v725_v45, 0.0  ;;  %v1274_v28 = vsel %vm771_vm0, %v749_v23, 0.0  ;;  %v703_v45 = vld [vmem:[%s4550_s0 + $0x5e0] sm:$0xff]  ;;  %v754_v23 = vld [vmem:[%s4550_s0 + $0x778] sm:$0xff] }
  0xd4   : > { %v897_v15 = vadd.f32 %v3708_v39, %v895_v25  ;;  %v1167_v41 = vadd.f32 %v1166_v40, %v1165_v4  ;;  %v1220_v42 = vadd.f32 %v1219_v46, %v1218_v3  ;;  %v1273_v10 = vadd.f32 %v1272_v31, %v1271_v59  ;;  %v752_v39 = vld [vmem:[%s4550_s0 + $0x768] sm:$0xff] }
  0xd5   : > { %v1100_v12 = vadd.f32 %v1099_v50, %v1098_v6  ;;  %v1168_v56 = vsel %vm771_vm0, %v701_v62, 0.0  ;;  %v1223_v29 = vsel %vm771_vm0, %v726_v18, 0.0  ;;  %v1276_v30 = vsel %vm771_vm0, %v750_v11, 0.0  ;;  %v672_v6 = vld [vmem:[%s4550_s0 + $0x4e8] sm:$0xff]  ;;  %v755_v18 = vld [vmem:[%s4550_s0 + $0x780] sm:$0xff] }
  0xd6   : > { %v1033_v5 = vadd.f32 %v4012_v19, %v1031_v49  ;;  %v1101_v36 = vsel %vm771_vm0, %v670_v1, 0.0  ;;  %v1222_v17 = vadd.f32 %v1221_v16, %v1220_v42  ;;  %v1275_v53 = vadd.f32 %v1274_v28, %v1273_v10  ;;  %v753_v19 = vld [vmem:[%s4550_s0 + $0x770] sm:$0xff] }
  0xd7   : > { %v966_v38 = vadd.f32 %v3875_v37, %v964_v63  ;;  %v1225_v24 = vsel %vm771_vm0, %v727_v9, 0.0  ;;  %v1278_v26 = vsel %vm771_vm0, %v751_v2, 0.0  ;;  %v899_v44 = vadd.f32 %v3722_v51, %v897_v15  ;;  %v730_v51 = vld [vmem:[%s4550_s0 + $0x6b8] sm:$0xff]  ;;  %v732_v63 = vld [vmem:[%s4550_s0 + $0x6c8] sm:$0xff]  ;;  %v673_v15 = vld [vmem:[%s4550_s0 + $0x4f0] sm:$0xff] }
  0xd8   : > { %v1169_v55 = vadd.f32 %v1168_v56, %v1167_v41  ;;  %v1224_v47 = vadd.f32 %v1223_v29, %v1222_v17  ;;  %v1277_v27 = vadd.f32 %v1276_v30, %v1275_v53  ;;  %v3016_v48 = vmov 0.0   ;;  %v757_v56 = vld [vmem:[%s4550_s0 + $0x790] sm:$0xff]  ;;  %v4586_v29 = vld [vmem:[#allocation21_spill] sm:$0xff] }
  0xd9   : > { %1348 = vst [vmem:[#allocation3] sm:$0xff] %v3016_v48  ;;  %1349 = vst [vmem:[#allocation3 + $0x8] sm:$0xff] %v3016_v48  ;;  %v1102_v37 = vadd.f32 %v1101_v36, %v1100_v12  ;;  %v1170_v52 = vsel %vm771_vm0, %v702_v32, 0.0  ;;  %v1227_v58 = vsel %vm771_vm0, %v728_v8, 0.0  ;;  %v1280_v0 = vsel %vm771_vm0, %v752_v39, 0.0  ;;  %v705_v17 = vld [vmem:[%s4550_s0 + $0x5f0] sm:$0xff] }
  0xda   : > { %v1035_v25 = vadd.f32 %v4027_v57, %v1033_v5  ;;  %v1103_v4 = vsel %vm771_vm0, %v671_v61, 0.0  ;;  %v1226_v43 = vadd.f32 %v1225_v24, %v1224_v47  ;;  %v1279_v60 = vadd.f32 %v1278_v26, %v1277_v27  ;;  %v731_v57 = vld [vmem:[%s4550_s0 + $0x6c0] sm:$0xff]  ;;  %v734_v53 = vld [vmem:[%s4550_s0 + $0x6d8] sm:$0xff] }
  0xdb   : > { %v832_v40 = vadd.f32 %v3572_v13, %v830_v20  ;;  %v968_v46 = vadd.f32 %v3886_v7, %v966_v38  ;;  %v1229_v31 = vsel %vm771_vm0, %v729_v14, 0.0  ;;  %v1282_v62 = vsel %vm771_vm0, %v753_v19, 0.0  ;;  %v704_v20 = vld [vmem:[%s4550_s0 + $0x5e8] sm:$0xff]  ;;  %v758_v61 = vld [vmem:[%s4550_s0 + $0x798] sm:$0xff] }
  0xdc   : > { %v901_v11 = vadd.f32 %v3725_v54, %v899_v44  ;;  %v1171_v49 = vadd.f32 %v1170_v52, %v1169_v55  ;;  %v1228_v50 = vadd.f32 %v1227_v58, %v1226_v43  ;;  %v1281_v3 = vadd.f32 %v1280_v0, %v1279_v60  ;;  %v756_v54 = vld [vmem:[%s4550_s0 + $0x788] sm:$0xff]  ;;  %v674_v19 = vld [vmem:[%s4550_s0 + $0x4f8] sm:$0xff] }
  0xdd   : > { %v1104_v13 = vadd.f32 %v1103_v4, %v1102_v37  ;;  %v1172_v7 = vsel %vm771_vm0, %v703_v45, 0.0  ;;  %v1231_v59 = vsel %vm771_vm0, %v730_v51, 0.0  ;;  %v1284_v1 = vsel %vm771_vm0, %v754_v23, 0.0  ;;  %v4587_v55 = vld [vmem:[#allocation22_spill] sm:$0xff]  ;;  %v706_v43 = vld [vmem:[%s4550_s0 + $0x5f8] sm:$0xff] }
  0xde   : > { %v1037_v16 = vadd.f32 %v4048_v34, %v1035_v25  ;;  %v1105_v28 = vsel %vm771_vm0, %v672_v6, 0.0  ;;  %v1230_v9 = vadd.f32 %v1229_v31, %v1228_v50  ;;  %v1283_v2 = vadd.f32 %v1282_v62, %v1281_v3  ;;  %v733_v34 = vld [vmem:[%s4550_s0 + $0x6d0] sm:$0xff]  ;;  %v735_v37 = vld [vmem:[%s4550_s0 + $0x6e0] sm:$0xff]  ;;  %v736_v60 = vld [vmem:[%s4550_s0 + $0x6e8] sm:$0xff] }
  0xdf   : > { %v834_v41 = vadd.f32 %v3581_v21, %v832_v40  ;;  %v970_v42 = vadd.f32 %v3901_v22, %v968_v46  ;;  %v1233_v10 = vsel %vm771_vm0, %v731_v57, 0.0  ;;  %v1286_v12 = vsel %vm771_vm0, %v755_v18, 0.0  ;;  %v760_v6 = vld [vmem:[%s4550_s0 + $0x7a8] sm:$0xff]  ;;  %v737_v50 = vld [vmem:[%s4550_s0 + $0x6f0] sm:$0xff] }
  0xe0   : > { %v903_v30 = vadd.f32 %v4586_v29, %v901_v11  ;;  %v1173_v32 = vadd.f32 %v1172_v7, %v1171_v49  ;;  %v1232_v8 = vadd.f32 %v1231_v59, %v1230_v9  ;;  %v1285_v39 = vadd.f32 %v1284_v1, %v1283_v2  ;;  %v761_v3 = vld [vmem:[%s4550_s0 + $0x7b0] sm:$0xff] }
  0xe1   : > { %v1106_v21 = vadd.f32 %v1105_v28, %v1104_v13  ;;  %v1174_v22 = vsel %vm771_vm0, %v704_v20, 0.0  ;;  %v1235_v5 = vsel %vm771_vm0, %v732_v63, 0.0  ;;  %v1288_v36 = vsel %vm771_vm0, %v756_v54, 0.0  ;;  %v762_v28 = vld [vmem:[%s4550_s0 + $0x7b8] sm:$0xff] }
  0xe2   : > { %v1039_v38 = vadd.f32 %v4063_v35, %v1037_v16  ;;  %v1107_v24 = vsel %vm771_vm0, %v673_v15, 0.0  ;;  %v1234_v26 = vadd.f32 %v1233_v10, %v1232_v8  ;;  %v1287_v14 = vadd.f32 %v1286_v12, %v1285_v39  ;;  %v759_v35 = vld [vmem:[%s4550_s0 + $0x7a0] sm:$0xff]  ;;  %v738_v16 = vld [vmem:[%s4550_s0 + $0x6f8] sm:$0xff] }
  0xe3   : > { %v835_v44 = vrot.slane %v834_v41, 4  ;;  %v972_v47 = vadd.f32 %v4587_v55, %v970_v42  ;;  %v1237_v27 = vsel %vm771_vm0, %v733_v34, 0.0  ;;  %v1290_v48 = vsel %vm771_vm0, %v757_v56, 0.0  ;;  %v763_v34 = vld [vmem:[%s4550_s0 + $0x7c0] sm:$0xff] }
  0xe4   : > { %v904_v52 = vrot.slane %v903_v30, 4  ;;  %v1175_v58 = vadd.f32 %v1174_v22, %v1173_v32  ;;  %v1236_v0 = vadd.f32 %v1235_v5, %v1234_v26  ;;  %v1289_v45 = vadd.f32 %v1288_v36, %v1287_v14  ;;  %v764_v22 = vld [vmem:[%s4550_s0 + $0x7c8] sm:$0xff] }
  0xe5   : > { %v1108_v51 = vadd.f32 %v1107_v24, %v1106_v21  ;;  %v1176_v23 = vsel %vm771_vm0, %v705_v17, 0.0  ;;  %v1239_v25 = vsel %vm771_vm0, %v734_v53, 0.0  ;;  %v1292_v4 = vsel %vm771_vm0, %v758_v61, 0.0  ;;  %v765_v24 = vld [vmem:[%s4550_s0 + $0x7d0] sm:$0xff] }
  0xe6   : > { %v1041_v40 = vadd.f32 %v4089_v33, %v1039_v38  ;;  %v1109_v46 = vsel %vm771_vm0, %v674_v19, 0.0  ;;  %v1238_v31 = vadd.f32 %v1237_v27, %v1236_v0  ;;  %v1291_v62 = vadd.f32 %v1290_v48, %v1289_v45  ;;  %v766_v27 = vld [vmem:[%s4550_s0 + $0x7d8] sm:$0xff]  ;;  %v767_v0 = vld [vmem:[%s4550_s0 + $0x7e0] sm:$0xff] }
  0xe7   : > { %v836_v57 = vadd.f32 %v835_v44, %v834_v41  ;;  %v973_v18 = vrot.slane %v972_v47, 4  ;;  %v1241_v11 = vsel %vm771_vm0, %v735_v37, 0.0  ;;  %v1294_v49 = vsel %vm771_vm0, %v759_v35, 0.0 }
  0xe8   : > { %v905_v13 = vadd.f32 %v904_v52, %v903_v30  ;;  %v1177_v33 = vadd.f32 %v1176_v23, %v1175_v58  ;;  %v1240_v7 = vadd.f32 %v1239_v25, %v1238_v31  ;;  %v1293_v59 = vadd.f32 %v1292_v4, %v1291_v62 }
  0xe9   : > { %v1110_v1 = vadd.f32 %v1109_v46, %v1108_v51  ;;  %v1178_v20 = vsel %vm771_vm0, %v706_v43, 0.0  ;;  %v1243_v63 = vsel %vm771_vm0, %v736_v60, 0.0  ;;  %v1296_v54 = vsel %vm771_vm0, %v760_v6, 0.0  ;;  %v768_v60 = vld [vmem:[%s4550_s0 + $0x7e8] sm:$0xff] }
  0xea   : > { %v1042_v9 = vrot.slane %v1041_v40, 4  ;;  %v1242_v2 = vadd.f32 %v1241_v11, %v1240_v7  ;;  %v1295_v15 = vadd.f32 %v1294_v49, %v1293_v59  ;;  %v837_v41 = vrot.slane %v836_v57, 2 }
  0xeb   : > { %v974_v42 = vadd.f32 %v973_v18, %v972_v47  ;;  %v1245_v10 = vsel %vm771_vm0, %v737_v50, 0.0  ;;  %v1298_v12 = vsel %vm771_vm0, %v761_v3, 0.0  ;;  %v906_v56 = vrot.slane %v905_v13, 2 }
  0xec   : > { %v1179_v29 = vadd.f32 %v1178_v20, %v1177_v33  ;;  %v1244_v30 = vadd.f32 %v1243_v63, %v1242_v2  ;;  %v1297_v32 = vadd.f32 %v1296_v54, %v1295_v15  ;;  %v1111_v8 = vrot.slane %v1110_v1, 4  ;;  %v770_v33 = vld [vmem:[%s4550_s0 + $0x7f8] sm:$0xff] }
  0xed   : > { %v1247_v39 = vsel %vm771_vm0, %v738_v16, 0.0  ;;  %v1300_v21 = vsel %vm771_vm0, %v762_v28, 0.0  ;;  %v1043_v5 = vadd.f32 %v1042_v9, %v1041_v40  ;;  %v838_v53 = vadd.f32 %v837_v41, %v836_v57  ;;  %v769_v57 = vld [vmem:[%s4550_s0 + $0x7f0] sm:$0xff] }
  0xee   : > { %v1246_v36 = vadd.f32 %v1245_v10, %v1244_v30  ;;  %v1299_v17 = vadd.f32 %v1298_v12, %v1297_v32  ;;  %v975_v61 = vrot.slane %v974_v42, 2  ;;  %v1302_v38 = vsel %vm771_vm0, %v763_v34, 0.0 }
  0xef   : > { %v907_v26 = vadd.f32 %v906_v56, %v905_v13  ;;  %v1180_v14 = vrot.slane %v1179_v29, 4  ;;  %v1112_v55 = vadd.f32 %v1111_v8, %v1110_v1  ;;  %v1304_v47 = vsel %vm771_vm0, %v764_v22, 0.0 }
  0xf0   : > { %v1248_v19 = vadd.f32 %v1247_v39, %v1246_v36  ;;  %v1301_v44 = vadd.f32 %v1300_v21, %v1299_v17  ;;  %v1044_v48 = vrot.slane %v1043_v5, 2  ;;  %v976_v35 = vadd.f32 %v975_v61, %v974_v42 }
  0xf1   : > { %v1306_v58 = vsel %vm771_vm0, %v765_v24, 0.0  ;;  %v839_v45 = vrot.slane %v838_v53, 1  ;;  %v908_v51 = vrot.slane %v907_v26, 1  ;;  %v1181_v23 = vadd.f32 %v1180_v14, %v1179_v29 }
  0xf2   : > { %v1303_v37 = vadd.f32 %v1302_v38, %v1301_v44  ;;  %v1249_v52 = vrot.slane %v1248_v19, 4  ;;  %v1113_v4 = vrot.slane %v1112_v55, 2  ;;  %v1308_v43 = vsel %vm771_vm0, %v766_v27, 0.0 }
  0xf3   : > { %v1045_v6 = vadd.f32 %v1044_v48, %v1043_v5  ;;  %v977_v46 = vrot.slane %v976_v35, 1  ;;  %v1310_v62 = vsel %vm771_vm0, %v767_v0, 0.0  ;;  %v840_v18 = vadd.f32 %v839_v45, %v838_v53 }
  0xf4   : > { %v1305_v25 = vadd.f32 %v1304_v47, %v1303_v37  ;;  %v1250_v31 = vadd.f32 %v1249_v52, %v1248_v19  ;;  %v909_v11 = vadd.f32 %v908_v51, %v907_v26  ;;  %v1182_v49 = vrot.slane %v1181_v23, 2 }
  0xf5   : > { %v1114_v3 = vadd.f32 %v1113_v4, %v1112_v55  ;;  %v1312_v13 = vsel %vm771_vm0, %v768_v60, 0.0  ;;  %v1046_v7 = vrot.slane %v1045_v6, 1  ;;  %v978_v1 = vadd.f32 %v977_v46, %v976_v35 }
  0xf6   : > { %v1307_v40 = vadd.f32 %v1306_v58, %v1305_v25  ;;  %v1251_v20 = vrot.slane %v1250_v31, 2  ;;  %v1314_v63 = vsel %vm771_vm0, %v769_v57, 0.0  ;;  %v1183_v54 = vadd.f32 %v1182_v49, %v1181_v23 }
  0xf7   : > { %v1333_v28 = vsel %vm1332_vm1, %v909_v11, %v840_v18  ;;  %v1115_v9 = vrot.slane %v1114_v3, 1  ;;  %v1316_v2 = vsel %vm771_vm0, %v770_v33, 0.0  ;;  %v1047_v15 = vadd.f32 %v1046_v7, %v1045_v6 }
  0xf8   : > { %v1309_v50 = vadd.f32 %v1308_v43, %v1307_v40  ;;  %v1252_v42 = vadd.f32 %v1251_v20, %v1250_v31  ;;  %v1335_v10 = vsel %vm1334_vm2, %v978_v1, %v1333_v28  ;;  %vm1336_vm3 = vcmask 1043459  }
  0xf9   : > { %v1184_v12 = vrot.slane %v1183_v54, 1  ;;  %v1116_v56 = vadd.f32 %v1115_v9, %v1114_v3  ;;  %v1337_v30 = vsel %vm1336_vm3, %v1047_v15, %v1335_v10  ;;  %vm1338_vm4 = vcmask 1044484  }
  0xfa   : > { %v1311_v59 = vadd.f32 %v1310_v62, %v1309_v50  ;;  %v1253_v32 = vrot.slane %v1252_v42, 1  ;;  %vm1340_vm5 = vcmask 1045509   ;;  %vm1342_vm6 = vcmask 1046534  }
  0xfb   : > { %v1185_v8 = vadd.f32 %v1184_v12, %v1183_v54  ;;  %v1339_v21 = vsel %vm1338_vm4, %v1116_v56, %v1337_v30  ;;  %vm1344_vm7 = vcmask 1047559  }
  0xfc   : > { %v1313_v16 = vadd.f32 %v1312_v13, %v1311_v59  ;;  %v1254_v5 = vadd.f32 %v1253_v32, %v1252_v42 }
  0xfd   : > { %v1341_v17 = vsel %vm1340_vm5, %v1185_v8, %v1339_v21 }
  0xfe   : > { %v1315_v41 = vadd.f32 %v1314_v63, %v1313_v16  ;;  %v1343_v61 = vsel %vm1342_vm6, %v1254_v5, %v1341_v17 }
 0x100   : > { %v1317_v34 = vadd.f32 %v1316_v2, %v1315_v41 }
 0x102   : > { %v1318_v29 = vrot.slane %v1317_v34, 4 }
 0x104   : > { %v1319_v39 = vadd.f32 %v1318_v29, %v1317_v34 }
 0x106   : > { %v1320_v22 = vrot.slane %v1319_v39, 2 }
 0x108   : > { %v1321_v36 = vadd.f32 %v1320_v22, %v1319_v39 }
 0x10a   : > { %v1322_v53 = vrot.slane %v1321_v36, 1 }
 0x10c   : > { %v1323_v38 = vadd.f32 %v1322_v53, %v1321_v36 }
 0x10e   : > { %v1345_v24 = vsel %vm1344_vm7, %v1323_v38, %v1343_v61 }
 0x10f   : > { %1347 = vst.msk [vmem:[#allocation2] sm:$0xff] %vm771_vm0, %v1345_v24 }
 0x110 PF: > { %v1355_v26 = vld [vmem:[%s3216_s26] sm:$0xff]  ;;  %vm1371_vm8 = vcmask 1043456   ;;  %v1356_v14 = vld [vmem:[%s3216_s26 + $0x8] sm:$0xff]  ;;  %v1471_v44 = vlaneseq  ;;  %v3017_v37 = vmov 0   ;;  %v3018_v45 = vmov 1983009808  }
 0x111   : > { %v1353_v19 = vld [vmem:[%s4551_s1] sm:$0xff]  ;;  %v2478_v55 = vcombine.high %v1355_v26, %v1355_v26  ;;  %v2480_v47 = vcombine.high %v1356_v14, %v1356_v14  ;;  %v2477_v27 = vcombine.low %v1355_v26, %v1355_v26  ;;  %v2479_v48 = vcombine.low %v1356_v14, %v1356_v14  ;;  %1416 = vmatprep.mubr.bf16.mxu0 %v3017_v37  ;;  %v2700_v18 = vld [vmem:[%s3221_s23 + $0x74] ss:$8 sps:$4 sm:$0xff]   ;;  %v2698_v50 = vld [vmem:[%s3221_s23 + $0x70] ss:$8 sps:$4 sm:$0xff]   ;;  %p2553_p8 = scmp.ne.s32.totalorder %s3000_s12, 3 }
 0x112   : > { %1457 = vmatprep.mubr.bf16.mxu1 %v3017_v37  ;;  %v1354_v35 = vpack.c.bf16 %v1353_v19, %v1353_v19  ;;  %v1352_v52 = vld [vmem:[%s3190_s27] sm:$0xff]  ;;  %v1469_v51 = vunpack.c.l.s4 %v3018_v45  ;;  %v4436_v23 = vshrl.u32 %v1471_v44, 7  ;;  %vm1367_vm9 = vcmask 64512  }
 0x113   : > { %2481 = vmatprep.subr.msk.bf16.mxu0 %vm1371_vm8, %v2478_v55  ;;  %2483 = vmatprep.subr.msk.bf16.mxu1 %vm1371_vm8, %v2480_v47  ;;  %v1373_v58 = vsel %vm1371_vm8, %v2477_v27, 0  ;;  %v1379_v0 = vsel %vm1371_vm8, %v2479_v48, 0  ;;  %v1467_v4 = vcombine.high %v1352_v52, %v1352_v52  ;;  %vm1488_vm10 = vcmask 1041408   ;;  %v2703_v11 = vld [vmem:[%s3221_s23 + $0x174] ss:$8 sps:$4 sm:$0xff]  }
 0x114   : > { %1399 = vmatpush1.bf16.msra.mxu0 %v1373_v58  ;;  %1440 = vmatpush1.bf16.msra.mxu1 %v1379_v0  ;;  %v1470_v25 = vunpack.c.0.s8 %v1469_v51  ;;  %vm1484_vm11 = vcmask 31744   ;;  %v2701_v3 = vld [vmem:[%s3221_s23 + $0x170] ss:$8 sps:$4 sm:$0xff]   ;;  %v2706_v13 = vld [vmem:[%s3221_s23 + $0x64] ss:$8 sps:$4 sm:$0xff]  }
 0x115   : > { %v2709_v33 = vld [vmem:[%s3221_s23 + $0x164] ss:$8 sps:$4 sm:$0xff]   ;;  %v2704_v7 = vld [vmem:[%s3221_s23 + $0x60] ss:$8 sps:$4 sm:$0xff]   ;;  %v2712_v1 = vld [vmem:[%s3221_s23 + $0x54] ss:$8 sps:$4 sm:$0xff]  }
 0x116   : > { %v1473_v43 = vsub.s32 %v1470_v25, %v4436_v23  ;;  %v1350_v40 = vld [vmem:[#allocation2] sm:$0xff]  ;;  %v2715_v20 = vld [vmem:[%s3221_s23 + $0x154] ss:$8 sps:$4 sm:$0xff]   ;;  %v2710_v63 = vld [vmem:[%s3221_s23 + $0x50] ss:$8 sps:$4 sm:$0xff]  }
 0x117   : > { %2482 = vmatmul.mubr.msk.bf16.vlgmr.msra.gmra.mxu0 %vm1367_vm9, %v1354_v35  ;;  %2484 = vmatmul.mubr.msk.bf16.vlgmr.msra.gmra.mxu1 %vm1367_vm9, %v1354_v35  ;;  %v1351_v49 = vpack.c.bf16 %v1350_v40, %v1350_v40  ;;  %v2707_v59 = vld [vmem:[%s3221_s23 + $0x160] ss:$8 sps:$4 sm:$0xff]   ;;  %v2713_v54 = vld [vmem:[%s3221_s23 + $0x150] ss:$8 sps:$4 sm:$0xff]   ;;  %v2718_v16 = vld [vmem:[%s3221_s23 + $0x44] ss:$8 sps:$4 sm:$0xff]  }
 0x118   : > { %1533 = vmatprep.mubr.bf16.mxu0 %v3017_v37  ;;  %1574 = vmatprep.mubr.bf16.mxu1 %v3017_v37  ;;  %v1474_v60 = vrot.slane %v1352_v52, %v1473_v43  ;;  %v1481_v6 = vrot.slane %v1467_v4, %v1473_v43  ;;  %v2721_v28 = vld [vmem:[%s3221_s23 + $0x144] ss:$8 sps:$4 sm:$0xff]   ;;  %v2716_v9 = vld [vmem:[%s3221_s23 + $0x40] ss:$8 sps:$4 sm:$0xff]   ;;  %v2724_v15 = vld [vmem:[%s3221_s23 + $0x34] ss:$8 sps:$4 sm:$0xff]  }
 0x119   : > { %v2719_v2 = vld [vmem:[%s3221_s23 + $0x140] ss:$8 sps:$4 sm:$0xff]   ;;  %v2727_v41 = vld [vmem:[%s3221_s23 + $0x134] ss:$8 sps:$4 sm:$0xff]   ;;  %v2722_v42 = vld [vmem:[%s3221_s23 + $0x30] ss:$8 sps:$4 sm:$0xff]  }
 0x11a   : > { %v1482_v46 = vcombine.high %v1474_v60, %v1474_v60  ;;  %v1483_v31 = vcombine.high %v1481_v6, %v1481_v6  ;;  %v1490_v62 = vsel %vm1488_vm10, %v1474_v60, 0  ;;  %v1496_v57 = vsel %vm1488_vm10, %v1481_v6, 0  ;;  %v2725_v10 = vld [vmem:[%s3221_s23 + $0x130] ss:$8 sps:$4 sm:$0xff]   ;;  %v2730_v12 = vld [vmem:[%s3221_s23 + $0x24] ss:$8 sps:$4 sm:$0xff]  }
 0x11b   : > { %v2733_v34 = vld [vmem:[%s3221_s23 + $0x124] ss:$8 sps:$4 sm:$0xff]   ;;  %v2728_v56 = vld [vmem:[%s3221_s23 + $0x20] ss:$8 sps:$4 sm:$0xff]   ;;  %v2736_v30 = vld [vmem:[%s3221_s23 + $0x14] ss:$8 sps:$4 sm:$0xff]  }
 0x11c   : > { %2485 = vmatprep.subr.msk.bf16.mxu0 %vm1488_vm10, %v1482_v46  ;;  %2487 = vmatprep.subr.msk.bf16.mxu1 %vm1488_vm10, %v1483_v31  ;;  %v2731_v29 = vld [vmem:[%s3221_s23 + $0x120] ss:$8 sps:$4 sm:$0xff]   ;;  %v2739_v32 = vld [vmem:[%s3221_s23 + $0x114] ss:$8 sps:$4 sm:$0xff]   ;;  %v2734_v8 = vld [vmem:[%s3221_s23 + $0x10] ss:$8 sps:$4 sm:$0xff]  }
 0x11d   : > { %1516 = vmatpush1.bf16.msra.mxu0 %v1490_v62  ;;  %1557 = vmatpush1.bf16.msra.mxu1 %v1496_v57  ;;  %v2737_v39 = vld [vmem:[%s3221_s23 + $0x110] ss:$8 sps:$4 sm:$0xff]   ;;  %v2742_v21 = vld [vmem:[%s3221_s23 + $0x4] ss:$8 sps:$4 sm:$0xff]   ;;  %v2740_v5 = vld [vmem:[%s3221_s23] ss:$8 sps:$4 sm:$0xff]  }
 0x11e   : > { %2003 = vmatprep.subr.bf16.mxu0 %v2700_v18  ;;  %2044 = vmatprep.subr.bf16.mxu1 %v2703_v11  ;;  %v2745_v22 = vld [vmem:[%s3221_s23 + $0x104] ss:$8 sps:$4 sm:$0xff]   ;;  %v2743_v36 = vld [vmem:[%s3221_s23 + $0x100] ss:$8 sps:$4 sm:$0xff]   ;;  %v2748_v17 = vld [vmem:[%s3221_s23 + $0xf4] ss:$8 sps:$4 sm:$0xff]  }
 0x11f   : > { %v2751_v53 = vld [vmem:[%s3221_s23 + $0x1f4] ss:$8 sps:$4 sm:$0xff]   ;;  %v2746_v61 = vld [vmem:[%s3221_s23 + $0xf0] ss:$8 sps:$4 sm:$0xff]   ;;  %v2754_v24 = vld [vmem:[%s3221_s23 + $0xe4] ss:$8 sps:$4 sm:$0xff]  }
 0x120   : > { %2486 = vmatmul.mubr.msk.bf16.vlgmr.msra.gmra.mxu0 %vm1484_vm11, %v1351_v49  ;;  %2488 = vmatmul.mubr.msk.bf16.vlgmr.msra.gmra.mxu1 %vm1484_vm11, %v1351_v49  ;;  %v2749_v38 = vld [vmem:[%s3221_s23 + $0x1f0] ss:$8 sps:$4 sm:$0xff]   ;;  %v2757_v26 = vld [vmem:[%s3221_s23 + $0x1e4] ss:$8 sps:$4 sm:$0xff]   ;;  %v2752_v14 = vld [vmem:[%s3221_s23 + $0xe0] ss:$8 sps:$4 sm:$0xff]  }
 0x121   : > { %2004 = vmatpush1.bf16.msra.mxu0 %v2698_v50  ;;  %2045 = vmatpush1.bf16.msra.mxu1 %v2701_v3  ;;  %v2755_v19 = vld [vmem:[%s3221_s23 + $0x1e0] ss:$8 sps:$4 sm:$0xff]   ;;  %v2760_v44 = vld [vmem:[%s3221_s23 + $0xd4] ss:$8 sps:$4 sm:$0xff]   ;;  %v2758_v47 = vld [vmem:[%s3221_s23 + $0xd0] ss:$8 sps:$4 sm:$0xff]  }
 0x122   : > { %2005 = vmatprep.subr.bf16.mxu0 %v2706_v13  ;;  %2046 = vmatprep.subr.bf16.mxu1 %v2709_v33  ;;  %v2763_v55 = vld [vmem:[%s3221_s23 + $0x1d4] ss:$8 sps:$4 sm:$0xff]   ;;  %v2761_v27 = vld [vmem:[%s3221_s23 + $0x1d0] ss:$8 sps:$4 sm:$0xff]   ;;  %v2764_v48 = vld [vmem:[%s3221_s23 + $0xc0] ss:$8 sps:$4 sm:$0xff]  }
 0x123   : > { %v2766_v37 = vld [vmem:[%s3221_s23 + $0xc4] ss:$8 sps:$4 sm:$0xff]   ;;  %v2767_v35 = vld [vmem:[%s3221_s23 + $0x1c0] ss:$8 sps:$4 sm:$0xff]   ;;  %v2770_v58 = vld [vmem:[%s3221_s23 + $0xb0] ss:$8 sps:$4 sm:$0xff]  }
 0x124   : > { %v2769_v52 = vld [vmem:[%s3221_s23 + $0x1c4] ss:$8 sps:$4 sm:$0xff]   ;;  %v2772_v0 = vld [vmem:[%s3221_s23 + $0xb4] ss:$8 sps:$4 sm:$0xff]   ;;  %v2773_v45 = vld [vmem:[%s3221_s23 + $0x1b0] ss:$8 sps:$4 sm:$0xff]  }
 0x125   : > { %2006 = vmatpush1.bf16.msra.mxu0 %v2704_v7  ;;  %2047 = vmatpush1.bf16.msra.mxu1 %v2707_v59  ;;  %v2775_v51 = vld [vmem:[%s3221_s23 + $0x1b4] ss:$8 sps:$4 sm:$0xff]   ;;  %v2778_v25 = vld [vmem:[%s3221_s23 + $0xa4] ss:$8 sps:$4 sm:$0xff]   ;;  %v2776_v43 = vld [vmem:[%s3221_s23 + $0xa0] ss:$8 sps:$4 sm:$0xff]  }
 0x126   : > { %2007 = vmatprep.subr.bf16.mxu0 %v2712_v1  ;;  %2048 = vmatprep.subr.bf16.mxu1 %v2715_v20  ;;  %v2781_v4 = vld [vmem:[%s3221_s23 + $0x1a4] ss:$8 sps:$4 sm:$0xff]   ;;  %v2779_v60 = vld [vmem:[%s3221_s23 + $0x1a0] ss:$8 sps:$4 sm:$0xff]   ;;  %v2784_v6 = vld [vmem:[%s3221_s23 + $0x94] ss:$8 sps:$4 sm:$0xff]  }
 0x127   : > { %v2787_v40 = vld [vmem:[%s3221_s23 + $0x194] ss:$8 sps:$4 sm:$0xff]   ;;  %v2782_v46 = vld [vmem:[%s3221_s23 + $0x90] ss:$8 sps:$4 sm:$0xff]   ;;  %v2790_v62 = vld [vmem:[%s3221_s23 + $0x84] ss:$8 sps:$4 sm:$0xff]  }
 0x128   : > { %v2785_v31 = vld [vmem:[%s3221_s23 + $0x190] ss:$8 sps:$4 sm:$0xff]   ;;  %v2793_v57 = vld [vmem:[%s3221_s23 + $0x184] ss:$8 sps:$4 sm:$0xff]   ;;  %v2788_v18 = vld [vmem:[%s3221_s23 + $0x80] ss:$8 sps:$4 sm:$0xff]  }
 0x129   : > { %2008 = vmatpush1.bf16.msra.mxu0 %v2710_v63  ;;  %2049 = vmatpush1.bf16.msra.mxu1 %v2713_v54  ;;  %v2791_v11 = vld [vmem:[%s3221_s23 + $0x180] ss:$8 sps:$4 sm:$0xff]   ;;  %v1587_v59 = vsub.s32 0, %v4436_v23  ;;  %v1595_v1 = vsub.s32 2, %v4436_v23 }
 0x12a   : > { %2009 = vmatprep.subr.bf16.mxu0 %v2718_v16  ;;  %2050 = vmatprep.subr.bf16.mxu1 %v2721_v28  ;;  %v1583_v54 = vld [vmem:[%s3197_s24] sm:$0xf]  ;;  %v1591_v16 = vsub.s32 1, %v4436_v23  ;;  %v1599_v28 = vsub.s32 3, %v4436_v23 }
 0x12d   : > { %2010 = vmatpush1.bf16.msra.mxu0 %v2716_v9  ;;  %2051 = vmatpush1.bf16.msra.mxu1 %v2719_v2  ;;  %v1588_v9 = vrot.slane %v1583_v54, %v1587_v59  ;;  %v1596_v2 = vrot.slane %v1583_v54, %v1595_v1 }
 0x12e   : > { %2011 = vmatprep.subr.bf16.mxu0 %v2724_v15  ;;  %2052 = vmatprep.subr.bf16.mxu1 %v2727_v41 }
 0x131   : > { %2012 = vmatpush1.bf16.msra.mxu0 %v2722_v42  ;;  %2053 = vmatpush1.bf16.msra.mxu1 %v2725_v10 }
 0x132   : > { %2013 = vmatprep.subr.bf16.mxu0 %v2730_v12  ;;  %2054 = vmatprep.subr.bf16.mxu1 %v2733_v34  ;;  %v1592_v12 = vrot.slane %v1583_v54, %v1591_v16  ;;  %v1600_v34 = vrot.slane %v1583_v54, %v1599_v28 }
 0x135   : > { %2014 = vmatpush1.bf16.msra.mxu0 %v2728_v56  ;;  %2055 = vmatpush1.bf16.msra.mxu1 %v2731_v29 }
 0x136   : > { %2015 = vmatprep.subr.bf16.mxu0 %v2736_v30  ;;  %2056 = vmatprep.subr.bf16.mxu1 %v2739_v32 }
 0x139   : > { %2016 = vmatpush1.bf16.msra.mxu0 %v2734_v8  ;;  %2057 = vmatpush1.bf16.msra.mxu1 %v2737_v39 }
 0x13a   : > { %2017 = vmatprep.subr.bf16.mxu0 %v2742_v21  ;;  %2058 = vmatprep.subr.bf16.mxu1 %v2745_v22 }
 0x13d   : > { %2018 = vmatpush1.bf16.msra.mxu0 %v2740_v5  ;;  %2059 = vmatpush1.bf16.msra.mxu1 %v2743_v36 }
 0x13e   : > { %2019 = vmatprep.subr.bf16.mxu0 %v2748_v17  ;;  %2060 = vmatprep.subr.bf16.mxu1 %v2751_v53 }
 0x141   : > { %2020 = vmatpush2.bf16.msra.mxu0 %v2746_v61  ;;  %2061 = vmatpush2.bf16.msra.mxu1 %v2749_v38 }
 0x142   : > { %2021 = vmatprep.subr.bf16.mxu0 %v2754_v24  ;;  %2062 = vmatprep.subr.bf16.mxu1 %v2757_v26 }
 0x145   : > { %2022 = vmatpush2.bf16.msra.mxu0 %v2752_v14  ;;  %2063 = vmatpush2.bf16.msra.mxu1 %v2755_v19 }
 0x146   : > { %2023 = vmatprep.subr.bf16.mxu0 %v2760_v44  ;;  %2064 = vmatprep.subr.bf16.mxu1 %v2763_v55 }
 0x149   : > { %2024 = vmatpush2.bf16.msra.mxu0 %v2758_v47  ;;  %2065 = vmatpush2.bf16.msra.mxu1 %v2761_v27  ;;  %v1613_v27 = vld [vmem:[#allocation3] sm:$0xff] }
 0x14a   : > { %2025 = vmatprep.subr.bf16.mxu0 %v2766_v37  ;;  %2066 = vmatprep.subr.bf16.mxu1 %v2769_v52  ;;  %v1614_v52 = vld [vmem:[#allocation3 + $0x8] sm:$0xff] }
 0x14d   : > { %2026 = vmatpush2.bf16.msra.mxu0 %v2764_v48  ;;  %2067 = vmatpush2.bf16.msra.mxu1 %v2767_v35 }
 0x14e   : > { %2027 = vmatprep.subr.bf16.mxu0 %v2772_v0  ;;  %2068 = vmatprep.subr.bf16.mxu1 %v2775_v51 }
 0x151   : > { %2028 = vmatpush2.bf16.msra.mxu0 %v2770_v58  ;;  %2069 = vmatpush2.bf16.msra.mxu1 %v2773_v45 }
 0x152   : > { %2029 = vmatprep.subr.bf16.mxu0 %v2778_v25  ;;  %2070 = vmatprep.subr.bf16.mxu1 %v2781_v4 }
 0x155   : > { %2030 = vmatpush2.bf16.msra.mxu0 %v2776_v43  ;;  %2071 = vmatpush2.bf16.msra.mxu1 %v2779_v60 }
 0x156   : > { %2031 = vmatprep.subr.bf16.mxu0 %v2784_v6  ;;  %2072 = vmatprep.subr.bf16.mxu1 %v2787_v40 }
 0x159   : > { %2032 = vmatpush2.bf16.msra.mxu0 %v2782_v46  ;;  %2073 = vmatpush2.bf16.msra.mxu1 %v2785_v31 }
 0x15a   : > { %2033 = vmatprep.subr.bf16.mxu0 %v2790_v62  ;;  %2074 = vmatprep.subr.bf16.mxu1 %v2793_v57 }
 0x15d   : > { %2034 = vmatpush2.bf16.msra.mxu0 %v2788_v18  ;;  %2075 = vmatpush2.bf16.msra.mxu1 %v2791_v11 }
 0x1d7   : > { %v1418_v49 = vpop.f32.mrf.mxu0  ;;  %v1459_v50 = vpop.f32.mrf.mxu1 }
 0x1d9   : > { %v1420_v3 = vpop.f32.mrf.mxu0  ;;  %v1461_v13 = vpop.f32.mrf.mxu1 }
 0x1db   : > { %v1422_v33 = vpop.f32.mrf.mxu0  ;;  %v1463_v7 = vpop.f32.mrf.mxu1 }
 0x1dd   : > { %v1423_v20 = vpop.f32.mrf.mxu0  ;;  %v1464_v63 = vpop.f32.mrf.mxu1 }
 0x1e0   : > { %v1535_v15 = vpop.f32.mrf.mxu0  ;;  %v1576_v41 = vpop.f32.mrf.mxu1 }
 0x1e1   : > { %v1536_v42 = vadd.f32 %v1535_v15, %v1418_v49  ;;  %v1577_v10 = vadd.f32 %v1576_v41, %v1459_v50 }
 0x1e2   : > { %v1537_v56 = vpop.f32.mrf.mxu0  ;;  %v1578_v29 = vpop.f32.mrf.mxu1 }
 0x1e3   : > { %v1605_v30 = vadd.f32 %v1588_v9, %v1536_v42  ;;  %v1607_v32 = vadd.f32 %v1596_v2, %v1577_v10  ;;  %v1538_v8 = vadd.f32 %v1537_v56, %v1420_v3  ;;  %v1579_v39 = vadd.f32 %v1578_v29, %v1461_v13 }
 0x1e4   : > { %v1539_v21 = vpop.f32.mrf.mxu0  ;;  %v1580_v22 = vpop.f32.mrf.mxu1 }
 0x1e5   : > { %v1606_v5 = vadd.f32 %v1592_v12, %v1538_v8  ;;  %v1608_v36 = vadd.f32 %v1600_v34, %v1579_v39  ;;  %v1609_v17 = vmax.f32 %v1605_v30, 0.0  ;;  %v1611_v53 = vmax.f32 %v1607_v32, 0.0 }
 0x1e6   : > { %v1540_v61 = vpop.f32.mrf.mxu0  ;;  %v1581_v38 = vpop.f32.mrf.mxu1 }
 0x1e7   : > { %v1610_v24 = vmax.f32 %v1606_v5, 0.0  ;;  %v1612_v26 = vmax.f32 %v1608_v36, 0.0  ;;  %v1615_v44 = vpack.c.bf16 %v1609_v17, %v1609_v17  ;;  %v1617_v55 = vpack.c.bf16 %v1611_v53, %v1611_v53 }
 0x1e9   : > { %v1616_v14 = vpack.c.bf16 %v1610_v24, %v1610_v24  ;;  %v1618_v19 = vpack.c.bf16 %v1612_v26, %v1612_v26 }
 0x1eb   : > { %2035 = vmatprep.mubr.bf16.mxu0 %v1616_v14  ;;  %2076 = vmatprep.mubr.bf16.mxu1 %v1618_v19 }
 0x1ec   : > { %2036 = vmatmul.mubr.bf16.vlgmr.msra.gmra.mxu0 %v1615_v44  ;;  %2077 = vmatmul.mubr.bf16.vlgmr.msra.gmra.mxu1 %v1617_v55 }
 0x2ac   : > { %v2037_v47 = vpop.f32.mrf.mxu0  ;;  %v2078_v48 = vpop.f32.mrf.mxu1 }
 0x2ad   : > { %v2079_v37 = vadd.f32 %v2078_v48, %v2037_v47 }
 0x2ae   : > { %v2039_v35 = vpop.f32.mrf.mxu0  ;;  %v2080_v58 = vpop.f32.mrf.mxu1 }
 0x2af   : > { %v2085_v0 = vadd.f32 %v2079_v37, %v1613_v27  ;;  %v2081_v45 = vadd.f32 %v2080_v58, %v2039_v35  ;;  %2092 = sbr.rel (%p2553_p8) target bundleno = 925 (0x39d), region = 80 }
 0x2b0   : > { %v2041_v51 = vpop.f32.mrf.mxu0  ;;  %v2082_v25 = vpop.f32.mrf.mxu1 }
 0x2b1   : > { %2087 = vst [vmem:[#allocation3] sm:$0xff] %v2085_v0  ;;  %v2086_v4 = vadd.f32 %v2081_v45, %v1614_v52 }
 0x2b2   : > { %v2042_v43 = vpop.f32.mrf.mxu0  ;;  %v2083_v60 = vpop.f32.mrf.mxu1 }
 0x2b3   : > { %2088 = vst [vmem:[#allocation3 + $0x8] sm:$0xff] %v2086_v4 }
 0x2b4   : > { %v2794_v6 = vld [vmem:[#allocation10 + $0x78] sm:$0xff]   ;;  %v2796_v46 = vld [vmem:[#allocation10 + $0x70] sm:$0xff]   ;;  %v2798_v62 = vld [vmem:[#allocation10 + $0x68] sm:$0xff]  }
 0x2b5   : > { %v2795_v40 = vld [vmem:[#allocation10 + $0x38] sm:$0xff]   ;;  %2578 = vmatprep.subr.bf16.mxu0 %v2794_v6  ;;  %v2797_v31 = vld [vmem:[#allocation10 + $0x30] sm:$0xff]   ;;  %v2799_v57 = vld [vmem:[#allocation10 + $0x28] sm:$0xff]  }
 0x2b6   : > { %2579 = vmatpush3.bf16.msra.mxu0 %v2795_v40  ;;  %v2800_v18 = vld [vmem:[#allocation10 + $0x60] sm:$0xff]   ;;  %v2802_v49 = vld [vmem:[#allocation10 + $0x58] sm:$0xff]   ;;  %v2804_v3 = vld [vmem:[#allocation10 + $0x50] sm:$0xff]  }
 0x2b7   : > { %2580 = vmatprep.subr.bf16.mxu0 %v2796_v46  ;;  %v2801_v11 = vld [vmem:[#allocation10 + $0x20] sm:$0xff]   ;;  %v2803_v50 = vld [vmem:[#allocation10 + $0x18] sm:$0xff]   ;;  %v2805_v1 = vld [vmem:[#allocation10 + $0x10] sm:$0xff]  }
 0x2b8   : > { %v2095_v33 = vld [vmem:[#allocation9] sm:$0x3]  ;;  %v2806_v63 = vld [vmem:[#allocation10 + $0x48] sm:$0xff]   ;;  %v2093_v2 = vld [vmem:[#allocation3] sm:$0xff] }
 0x2b9   : > { %v2104_v7 = vrot.slane %v2095_v33, %v1591_v16  ;;  %v2100_v28 = vrot.slane %v2095_v33, %v1587_v59  ;;  %v2807_v9 = vld [vmem:[#allocation10 + $0x8] sm:$0xff]   ;;  %v2808_v15 = vld [vmem:[#allocation10 + $0x40] sm:$0xff]  }
 0x2ba   : > { %2581 = vmatpush3.bf16.msra.mxu0 %v2797_v31  ;;  %v2094_v13 = vld [vmem:[#allocation3 + $0x8] sm:$0xff]  ;;  %v2554_v12 = vld [vmem:[%s4558_s8] ss:$0 sm:$0xff] }
 0x2bb   : > { %2582 = vmatprep.subr.bf16.mxu0 %v2798_v62  ;;  %v2108_v20 = vadd.f32 %v2104_v7, %v2094_v13  ;;  %v2107_v41 = vadd.f32 %v2100_v28, %v2093_v2  ;;  %v2809_v42 = vld [vmem:[#allocation10] sm:$0xff]  }
 0x2bd   : > { %v2110_v54 = vpack.c.bf16 %v2108_v20, %v2108_v20  ;;  %v2109_v16 = vpack.c.bf16 %v2107_v41, %v2107_v41 }
 0x2be   : > { %2583 = vmatpush3.bf16.msra.mxu0 %v2799_v57 }
 0x2bf   : > { %2584 = vmatprep.subr.bf16.mxu0 %v2800_v18  ;;  %2278 = vmatprep.mubr.bf16.mxu0 %v2110_v54 }
 0x2c2   : > { %2585 = vmatpush3.bf16.msra.mxu0 %v2801_v11 }
 0x2c3   : > { %2586 = vmatprep.subr.bf16.mxu0 %v2802_v49 }
 0x2c6   : > { %2587 = vmatpush3.bf16.msra.mxu0 %v2803_v50 }
 0x2c7   : > { %2588 = vmatprep.subr.bf16.mxu0 %v2804_v3 }
 0x2ca   : > { %2589 = vmatpush3.bf16.msra.mxu0 %v2805_v1 }
 0x2cb   : > { %2590 = vmatprep.subr.bf16.mxu0 %v2806_v63 }
 0x2ce   : > { %2591 = vmatpush3.bf16.msra.mxu0 %v2807_v9 }
 0x2cf   : > { %2592 = vmatprep.subr.bf16.mxu0 %v2808_v15 }
 0x2d2   : > { %2593 = vmatpush3.bf16.msra.mxu0 %v2809_v42 }
 0x2d5   : > { %2279 = vmatmul.mubr.bf16.vlgmr.msra.gmra.mxu0 %v2109_v16 }
 0x395   : > { %v2594_v10 = vpop.f32.mrf.mxu0 }
 0x397   : > { %v2595_v23 = vpop.f32.mrf.mxu0 }
 0x398   : > { %v2596_v59 = vadd.f32 %v2595_v23, %v2594_v10 }
 0x399   : > { %v2597_v34 = vpop.f32.mrf.mxu0 }
 0x39a   : > { %v2281_v56 = vadd.f32 %v2596_v59, %v2554_v12 }
 0x39b   : > { %v2598_v29 = vpop.f32.mrf.mxu0 }
 0x39c   : > { %2286 = vst [vmem:[#allocation12] sm:$0xff] %v2281_v56 }
 0x39d PF: > { %p2635_p11 = scmp.eq.s32.totalorder %s3099_s15, 3  ;;  %s3019_s24 = smov [#allocation12]  }
 0x39e   : > { %s2296_s26 = sshll.u32 %s3019_s24, 4  ;;  %s2297_s26 = int_to_ptr.vmem [resolvable:$true] %s2296_s26 }
 0x39f   : > { %s2918_s23 = scalar_lea.vmem %s2297_s26, 128  ;;  %p2925_p3 = scmp.lt.s32.totalorder %s2297_s26, %s2297_s26 }
 0x3a0   : > { %p2919_p12 = scmp.ne.s32.totalorder %s2297_s26, %s2918_s23  ;;  %p2926_p13 = scmp.lt.s32.totalorder %s2918_s23, %s2918_s23 }
 0x3a2   : > { %p2920_p0 = pnand %p2919_p12, %p2635_p11  ;;  %p2927_p7 = por %p2926_p13, %p2925_p3 }
 0x3a4   : > { %p2921_p2 = pneg %p2920_p0 }
 0x3a6   : > { %p2928_p6 = pnand %p2927_p7, %p2921_p2 }
 0x3a8   : > { %2931 = shalt.err (!%p2928_p6)
}
 0x3a9   : > { %2613 = dma.vmem_to_hbm [thread:$0]  (%p2635_p11), %s2297_s26, 128, %s4559_s9, [#allocation6]  }
 0x3aa   : > { %2983 = dma.done.wait (%p2635_p11), [#allocation6], 128  }
 0x3ab   : > { %2985 = vsyncadd (%p2635_p11), [#allocation6], 4294967168 }
 0x3ac PF: > { %s27_s14 = sadd.s32 1, %s3008_s14   ;;  %s4588_s2 = sld [smem:[#allocation18_spill]] }
 0x3ad   : > { %p24_p9 = scmp.ge.s32.totalorder %s27_s14, 6   ;;  %s4589_s11 = sld [smem:[#allocation20_spill]] }
 0x3ae   : > { %s4590_s17 = sld [smem:[#allocation19_spill]]  ;;  %s4591_s30 = smov %s2992_s10 }
 0x3af   : > { %s4593_s12 = smov %s3004_s13 }
 0x3b0   :  { %26 = sbr.rel (!%p24_p9) target bundleno = 12 (0xc), region = 135 }
 0x3b2   : > { %s4592_s10 = smov %s4588_s2 }
 0x3b4   : > { %s4594_s13 = smov %s4590_s17 }
 0x3b5   :  { %2309 = vsyncpa [#allocation5], 1 }
 0x3b6   :  { %2311 = vsyncpa [#allocation5 + $0x1], 1 }
 0x3b7   :  { %2312 = vsyncpa [#allocation8], 1 }
 0x3b8   :  { %2314 = vsyncpa [#allocation8 + $0x1], 1 }
 0x3b9   :  { %2315 = vsyncpa [#allocation11], 1 }
 0x3ba   :  { %2316 = vsyncpa [#allocation6], 1 }
 0x3bb   :  { %2318 = vsyncpa [#allocation6 + $0x1], 1 }

</bundles_post_ra>
